<compile_context>
chip_gen: v7x
topology: tpu7x:2x2x1
jax: 0.10.0
libtpu: 0.0.40
codegen_flags: <defaults>
</compile_context>

<pallas_src>
import numpy as np

import jax
import jax.numpy as jnp
from jax.experimental import pallas as pl
from jax.experimental.pallas import tpu as pltpu

_VMEM = pl.BlockSpec(memory_space=pltpu.MemorySpace.VMEM)

_OPERAND_ORDER = ("t1", "b1", "t2e", "t2o", "b2", "ti", "bi", "t4", "b4",
                  "f1a", "f1b", "f1bias", "f2", "f2b")


# ----------------------------------------------------------------------------
# The single fused Pallas kernel
# ----------------------------------------------------------------------------
def _fused_forward_kernel(x_ref, t1_ref, b1_ref, t2e_ref, t2o_ref, b2_ref,
                          ti_ref, bi_ref, t4_ref, b4_ref,
                          f1a_ref, f1b_ref, f1bias_ref, f2_ref, f2b_ref,
                          out_ref):
    f32 = jnp.float32

    def mm(a, w):
        return jnp.dot(a, w, preferred_element_type=f32)

    x = x_ref[...]                                           # (B, L)

    # conv1 (k=10, s=2) + ReLU + max_pool1d(k=2, s=2):
    # even / odd output positions live in the two column sections of t1.
    a1 = mm(x, t1_ref[...])                                  # (B, 2*SEC1)
    sec1 = a1.shape[1] // 2
    p1 = jnp.maximum(
        jnp.maximum(a1[:, :sec1], a1[:, sec1:]) + b1_ref[...], 0.0)

    # conv2 (k=10, s=2) + ReLU + max_pool1d(k=2, s=2).
    # q's three 128-lane sections hold the pooled signal and its +-1 shifted
    # copies (used below for branch 4's k=3/s=1/p=1 max pool).
    q = jnp.maximum(
        jnp.maximum(mm(p1, t2e_ref[...]), mm(p1, t2o_ref[...])) + b2_ref[...],
        0.0)                                                 # (B, 3*SEC2)
    sec2 = q.shape[1] // 3
    p2 = q[:, :sec2]
    m = jnp.maximum(p2, jnp.maximum(q[:, sec2:2 * sec2], q[:, 2 * sec2:]))

    # inception branches 1..3 (1x1 / k3p1 / k5p2) merged into one k=5 matmul.
    ybr = jnp.maximum(mm(p2, ti_ref[...]) + bi_ref[...], 0.0)   # (B, L4*24)
    # branch 4: MaxPool1d(3,1,1) (== m, activations are >= 0) then 1x1 conv + ReLU.
    yb4 = jnp.maximum(mm(m, t4_ref[...]) + b4_ref[...], 0.0)    # (B, L4*8)

    # fc1 with eval-mode BatchNorm folded in, + ReLU.  fc1 rows are pre-permuted
    # so torch's channel-major .view(B, -1) flatten is absorbed into the weights.
    h = jnp.maximum(
        mm(ybr, f1a_ref[...]) + mm(yb4, f1b_ref[...]) + f1bias_ref[...], 0.0)
    # dropout(p=0.2) is the identity in inference mode.
    # TODO(synk): training-mode dropout (random mask) intentionally not applied.

    # fc2 + softmax (dim=1) epilogue.
    logits = mm(h, f2_ref[...]) + f2b_ref[...]
    e = jnp.exp(logits - jnp.max(logits, axis=-1, keepdims=True))
    out_ref[...] = e / jnp.sum(e, axis=-1, keepdims=True)


def inception_network_forward(operands, x):
    """x: (B, 1, L) float32 -> (B, num_classes) softmax probabilities."""
    B = x.shape[0]
    x2d = x.reshape(B, x.shape[-1]).astype(jnp.float32)
    args = [x2d] + [operands[k] for k in _OPERAND_ORDER]
    return pl.pallas_call(
        _fused_forward_kernel,
        out_shape=jax.ShapeDtypeStruct((B, operands["f2"].shape[1]), jnp.float32),
        in_specs=[_VMEM] * len(args),
        out_specs=_VMEM,
    )(*args)


# ----------------------------------------------------------------------------
# Parameter preparation (host side, once): conv -> Toeplitz, BN fold, permutes.
# ----------------------------------------------------------------------------
def prepare_operands(params, L):
    C1, C2, CB, C4 = 8, 16, 24, 8            # conv1 / conv2 / branches123 / branch4 chans
    K1 = K2 = 10
    L1 = (L - K1) // 2 + 1                    # after conv1 (stride 2)
    L2 = L1 // 2                              # after max_pool1d(2)
    L3 = (L2 - K2) // 2 + 1                   # after conv2 (stride 2)
    L4 = L3 // 2                              # after max_pool1d(2)
    SEC1 = ((L2 * C1 + 127) // 128) * 128     # 128-aligned section widths
    SEC2 = ((L4 * C2 + 127) // 128) * 128

    def npf(a):
        return np.asarray(a, np.float32)

    # ---- conv1: (L,) -> even/odd pooled-position sections, lane = l2*8 + c ----
    w1, b1 = npf(params["conv1_w"]), npf(params["conv1_b"])
    T1 = np.zeros((L, 2 * SEC1), np.float32)
    B1 = np.zeros((1, SEC1), np.float32)
    for par in (0, 1):                        # even / odd conv1 output position
        for l2 in range(L2):
            l1 = 2 * l2 + par
            for co in range(C1):
                col = par * SEC1 + l2 * C1 + co
                for k in range(K1):
                    T1[2 * l1 + k, col] = w1[co, 0, k]
    for l2 in range(L2):
        for co in range(C1):
            B1[0, l2 * C1 + co] = b1[co]

    # ---- conv2: sections [pooled | shift-left | shift-right], lane = l4*16 + c ----
    w2, b2 = npf(params["conv2_w"]), npf(params["conv2_b"])
    T2 = [np.zeros((SEC1, 3 * SEC2), np.float32) for _ in range(2)]
    B2 = np.zeros((1, 3 * SEC2), np.float32)
    for par in (0, 1):                        # even / odd conv2 output position
        T = T2[par]
        for sec, shift in enumerate((0, -1, +1)):
            for l4 in range(L4):
                lsrc = l4 + shift             # pooled position held by this block
                if not (0 <= lsrc < L4):
                    continue                  # zero block == -inf pad (acts >= 0)
                l3 = 2 * lsrc + par
                for co in range(C2):
                    col = sec * SEC2 + l4 * C2 + co
                    for ci in range(C1):
                        for k in range(K2):
                            T[(2 * l3 + k) * C1 + ci, col] = w2[co, ci, k]
    for sec, shift in enumerate((0, -1, +1)):
        for l4 in range(L4):
            if 0 <= l4 + shift < L4:
                for co in range(C2):
                    B2[0, sec * SEC2 + l4 * C2 + co] = b2[co]

    # ---- inception branches 1..3 merged into one k=5, pad=2 Toeplitz matmul ----
    wm = np.zeros((CB, C2, 5), np.float32)
    wm[0:8, :, 2] = npf(params["b1_w"])[:, :, 0]     # 1x1 -> centre tap
    wm[8:16, :, 1:4] = npf(params["b2_w"])           # k=3, pad=1
    wm[16:24, :, :] = npf(params["b3_w"])            # k=5, pad=2
    bm = np.concatenate([npf(params["b1_b"]), npf(params["b2_b"]),
                         npf(params["b3_b"])])
    Ti = np.zeros((SEC2, L4 * CB), np.float32)
    Bi = np.zeros((1, L4 * CB), np.float32)
    for lo in range(L4):
        for cb in range(CB):
            col = lo * CB + cb
            Bi[0, col] = bm[cb]
            for t in range(5):
                li = lo + t - 2
                if 0 <= li < L4:
                    for ci in range(C2):
                        Ti[li * C2 + ci, col] = wm[cb, ci, t]

    # ---- inception branch 4: 1x1 conv on the k3s1p1-pooled signal ----
    w4, b4 = npf(params["b4_w"])[:, :, 0], npf(params["b4_b"])
    T4 = np.zeros((SEC2, L4 * C4), np.float32)
    B4 = np.zeros((1, L4 * C4), np.float32)
    for lo in range(L4):
        for co in range(C4):
            col = lo * C4 + co
            B4[0, col] = b4[co]
            for ci in range(C2):
                T4[lo * C2 + ci, col] = w4[co, ci]

    # ---- fc1 with eval-mode BatchNorm folded in, split per branch layout ----
    # TODO(synk): training-mode BatchNorm (batch statistics) not implemented.
    fc1_w, fc1_b = npf(params["fc1_w"]), npf(params["fc1_b"])   # (32*L4, 128)
    scale = npf(params["bn1_gamma"]) / np.sqrt(npf(params["bn1_var"]) + 1e-5)
    wf = fc1_w * scale[None, :]
    bf = (fc1_b - npf(params["bn1_mean"])) * scale + npf(params["bn1_beta"])
    F1a = np.zeros((L4 * CB, 128), np.float32)   # rows: ybr layout lo*24 + cb
    F1b = np.zeros((L4 * C4, 128), np.float32)   # rows: yb4 layout lo*8  + c
    for lo in range(L4):
        for cb in range(CB):                      # torch channels 0..23
            F1a[lo * CB + cb] = wf[cb * L4 + lo]
        for c in range(C4):                       # torch channels 24..31
            F1b[lo * C4 + c] = wf[(CB + c) * L4 + lo]

    ops = dict(
        t1=T1, b1=B1, t2e=T2[0], t2o=T2[1], b2=B2,
        ti=Ti, bi=Bi, t4=T4, b4=B4,
        f1a=F1a, f1b=F1b, f1bias=bf.reshape(1, -1),
        f2=npf(params["fc2_w"]), f2b=npf(params["fc2_b"]).reshape(1, -1),
    )
    return {k: jnp.asarray(v) for k, v in ops.items()}


# ----------------------------------------------------------------------------
# Deterministic in-script parameters (PyTorch layouts)
# ----------------------------------------------------------------------------
def init_params(fc1_in, num_classes=2):
    key = jax.random.PRNGKey(42)
    ks = jax.random.split(key, 20)

    def w(k, shape, scale=0.1):
        return jax.random.normal(k, shape, jnp.float32) * scale

    p = {}
    p["conv1_w"] = w(ks[0], (8, 1, 10));   p["conv1_b"] = w(ks[1], (8,), 0.01)
    p["conv2_w"] = w(ks[2], (16, 8, 10));  p["conv2_b"] = w(ks[3], (16,), 0.01)
    # inception(16, 8, 8, 8, 8)
    p["b1_w"] = w(ks[4], (8, 16, 1));  p["b1_b"] = w(ks[5], (8,), 0.01)
    p["b2_w"] = w(ks[6], (8, 16, 3));  p["b2_b"] = w(ks[7], (8,), 0.01)
    p["b3_w"] = w(ks[8], (8, 16, 5));  p["b3_b"] = w(ks[9], (8,), 0.01)
    p["b4_w"] = w(ks[10], (8, 16, 1)); p["b4_b"] = w(ks[11], (8,), 0.01)
    # fc1 stored as (in, out) with rows in torch .view(B,-1) (channel-major) order
    p["fc1_w"] = w(ks[12], (fc1_in, 128), 0.05)
    p["fc1_b"] = w(ks[13], (128,), 0.01)
    p["bn1_gamma"] = 1.0 + 0.1 * jax.random.normal(ks[14], (128,), jnp.float32)
    p["bn1_beta"] = 0.1 * jax.random.normal(ks[15], (128,), jnp.float32)
    p["bn1_mean"] = 0.1 * jax.random.normal(ks[16], (128,), jnp.float32)
    p["bn1_var"] = jax.random.uniform(ks[17], (128,), jnp.float32, 0.5, 1.5)
    p["fc2_w"] = w(ks[18], (128, num_classes))
    p["fc2_b"] = w(ks[19], (num_classes,), 0.01)
    return p


# ----------------------------------------------------------------------------
# Pure-JAX reference (PyTorch semantics) used only to validate the fused kernel
# ----------------------------------------------------------------------------
def reference_forward(params, x):
    HIGH = jax.lax.Precision.HIGHEST

    def conv1d(x, w, b, stride=1, padding=0):
        y = jax.lax.conv_general_dilated(
            x, w, (stride,), [(padding, padding)],
            dimension_numbers=("NCH", "OIH", "NCH"), precision=HIGH)
        return y + b[None, :, None]

    def maxpool(x, k, s, p=0):
        return jax.lax.reduce_window(
            x, -jnp.inf, jax.lax.max, (1, 1, k), (1, 1, s),
            [(0, 0), (0, 0), (p, p)])

    y = jax.nn.relu(conv1d(x, params["conv1_w"], params["conv1_b"], 2))
    y = maxpool(y, 2, 2)
    y = jax.nn.relu(conv1d(y, params["conv2_w"], params["conv2_b"], 2))
    y = maxpool(y, 2, 2)
    b1 = jax.nn.relu(conv1d(y, params["b1_w"], params["b1_b"]))
    b2 = jax.nn.relu(conv1d(y, params["b2_w"], params["b2_b"], 1, 1))
    b3 = jax.nn.relu(conv1d(y, params["b3_w"], params["b3_b"], 1, 2))
    b4 = jax.nn.relu(conv1d(maxpool(y, 3, 1, 1), params["b4_w"], params["b4_b"]))
    y = jnp.concatenate([b1, b2, b3, b4], axis=1)
    y = y.reshape(x.shape[0], -1)
    y = jnp.dot(y, params["fc1_w"], precision=HIGH) + params["fc1_b"]
    scale = params["bn1_gamma"] * jax.lax.rsqrt(params["bn1_var"] + 1e-5)
    y = jax.nn.relu((y - params["bn1_mean"]) * scale + params["bn1_beta"])
    y = jnp.dot(y, params["fc2_w"], precision=HIGH) + params["fc2_b"]
    return jax.nn.softmax(y, axis=-1)


# ----------------------------------------------------------------------------
if __name__ == "__main__":
    B, L = 2, 128                      # input x: (B, 1, L) like the PyTorch module
    x = jax.random.normal(jax.random.PRNGKey(0), (B, 1, L), jnp.float32)

    # Derive the lazily-created fc1 input size exactly as the module does.
    L1 = (L - 10) // 2 + 1             # conv1
    L2 = L1 // 2                       # maxpool k2
    L3 = (L2 - 10) // 2 + 1            # conv2
    L4 = L3 // 2                       # maxpool k2
    fc1_in = 32 * L4                   # inception output channels = 8*4 = 32

    params = init_params(fc1_in, num_classes=2)
    operands = prepare_operands(params, L)

    fwd = jax.jit(inception_network_forward)
    out = jax.block_until_ready(fwd(operands, x))
    ref = jax.block_until_ready(reference_forward(params, x))

    assert out.shape == (B, 2)
    assert bool(jnp.all(jnp.isfinite(out)))
    assert bool(jnp.allclose(jnp.sum(out, axis=-1), 1.0, atol=1e-5))
    assert bool(jnp.allclose(out, ref, atol=1e-4, rtol=1e-4)), (out, ref)
    print("KERNEL_OK")
</pallas_src>

<mosaic_0001>
module attributes {stable_mosaic.version = 11 : i64} {
  func.func @_fused_forward_kernel(%arg0: memref<2x128xf32, #tpu.memory_space<vmem>>, %arg1: memref<128x512xf32, #tpu.memory_space<vmem>>, %arg2: memref<1x256xf32, #tpu.memory_space<vmem>>, %arg3: memref<256x384xf32, #tpu.memory_space<vmem>>, %arg4: memref<256x384xf32, #tpu.memory_space<vmem>>, %arg5: memref<1x384xf32, #tpu.memory_space<vmem>>, %arg6: memref<128x120xf32, #tpu.memory_space<vmem>>, %arg7: memref<1x120xf32, #tpu.memory_space<vmem>>, %arg8: memref<128x40xf32, #tpu.memory_space<vmem>>, %arg9: memref<1x40xf32, #tpu.memory_space<vmem>>, %arg10: memref<120x128xf32, #tpu.memory_space<vmem>>, %arg11: memref<40x128xf32, #tpu.memory_space<vmem>>, %arg12: memref<1x128xf32, #tpu.memory_space<vmem>>, %arg13: memref<128x2xf32, #tpu.memory_space<vmem>>, %arg14: memref<1x2xf32, #tpu.memory_space<vmem>>, %arg15: memref<2x2xf32, #tpu.memory_space<vmem>>) attributes {dimension_semantics = [], scalar_prefetch = 0 : i64, scratch_operands = 0 : i64, tpu.core_type = #tpu.core_type<tc>} {
    %c0 = arith.constant 0 : index
    %c0_0 = arith.constant 0 : index
    %0 = vector.load %arg0[%c0, %c0_0] : memref<2x128xf32, #tpu.memory_space<vmem>>, vector<2x128xf32>
    %c0_1 = arith.constant 0 : index
    %c0_2 = arith.constant 0 : index
    %1 = vector.load %arg1[%c0_1, %c0_2] : memref<128x512xf32, #tpu.memory_space<vmem>>, vector<128x512xf32>
    %cst = arith.constant dense<0.000000e+00> : vector<2x512xf32>
    %2 = tpu.matmul %0, %1, %cst {dimension_numbers = #tpu.dot_dimension_numbers<[1], [0], [0], [1], [0, 0, 1, 1], [], []>} : vector<2x128xf32>, vector<128x512xf32>, vector<2x512xf32> -> vector<2x512xf32>
    %3 = vector.extract_strided_slice %2 {offsets = [0, 0], sizes = [2, 256], strides = [1, 1]} : vector<2x512xf32> to vector<2x256xf32>
    %4 = vector.extract_strided_slice %2 {offsets = [0, 256], sizes = [2, 256], strides = [1, 1]} : vector<2x512xf32> to vector<2x256xf32>
    %5 = arith.maximumf %3, %4 : vector<2x256xf32>
    %c0_3 = arith.constant 0 : index
    %c0_4 = arith.constant 0 : index
    %6 = vector.load %arg2[%c0_3, %c0_4] : memref<1x256xf32, #tpu.memory_space<vmem>>, vector<1x256xf32>
    %7 = vector.broadcast %6 : vector<1x256xf32> to vector<2x256xf32>
    %8 = arith.addf %5, %7 : vector<2x256xf32>
    %cst_5 = arith.constant 0.000000e+00 : f32
    %9 = vector.broadcast %cst_5 : f32 to vector<2x256xf32>
    %10 = arith.maximumf %8, %9 : vector<2x256xf32>
    %c0_6 = arith.constant 0 : index
    %c0_7 = arith.constant 0 : index
    %11 = vector.load %arg3[%c0_6, %c0_7] : memref<256x384xf32, #tpu.memory_space<vmem>>, vector<256x384xf32>
    %cst_8 = arith.constant dense<0.000000e+00> : vector<2x384xf32>
    %12 = tpu.matmul %10, %11, %cst_8 {dimension_numbers = #tpu.dot_dimension_numbers<[1], [0], [0], [1], [0, 0, 1, 1], [], []>} : vector<2x256xf32>, vector<256x384xf32>, vector<2x384xf32> -> vector<2x384xf32>
    %c0_9 = arith.constant 0 : index
    %c0_10 = arith.constant 0 : index
    %13 = vector.load %arg4[%c0_9, %c0_10] : memref<256x384xf32, #tpu.memory_space<vmem>>, vector<256x384xf32>
    %cst_11 = arith.constant dense<0.000000e+00> : vector<2x384xf32>
    %14 = tpu.matmul %10, %13, %cst_11 {dimension_numbers = #tpu.dot_dimension_numbers<[1], [0], [0], [1], [0, 0, 1, 1], [], []>} : vector<2x256xf32>, vector<256x384xf32>, vector<2x384xf32> -> vector<2x384xf32>
    %15 = arith.maximumf %12, %14 : vector<2x384xf32>
    %c0_12 = arith.constant 0 : index
    %c0_13 = arith.constant 0 : index
    %16 = vector.load %arg5[%c0_12, %c0_13] : memref<1x384xf32, #tpu.memory_space<vmem>>, vector<1x384xf32>
    %17 = vector.broadcast %16 : vector<1x384xf32> to vector<2x384xf32>
    %18 = arith.addf %15, %17 : vector<2x384xf32>
    %cst_14 = arith.constant 0.000000e+00 : f32
    %19 = vector.broadcast %cst_14 : f32 to vector<2x384xf32>
    %20 = arith.maximumf %18, %19 : vector<2x384xf32>
    %21 = vector.extract_strided_slice %20 {offsets = [0, 0], sizes = [2, 128], strides = [1, 1]} : vector<2x384xf32> to vector<2x128xf32>
    %22 = vector.extract_strided_slice %20 {offsets = [0, 128], sizes = [2, 128], strides = [1, 1]} : vector<2x384xf32> to vector<2x128xf32>
    %23 = vector.extract_strided_slice %20 {offsets = [0, 256], sizes = [2, 128], strides = [1, 1]} : vector<2x384xf32> to vector<2x128xf32>
    %24 = arith.maximumf %22, %23 : vector<2x128xf32>
    %25 = arith.maximumf %21, %24 : vector<2x128xf32>
    %c0_15 = arith.constant 0 : index
    %c0_16 = arith.constant 0 : index
    %26 = vector.load %arg6[%c0_15, %c0_16] : memref<128x120xf32, #tpu.memory_space<vmem>>, vector<128x120xf32>
    %cst_17 = arith.constant dense<0.000000e+00> : vector<2x120xf32>
    %27 = tpu.matmul %21, %26, %cst_17 {dimension_numbers = #tpu.dot_dimension_numbers<[1], [0], [0], [1], [0, 0, 1, 1], [], []>} : vector<2x128xf32>, vector<128x120xf32>, vector<2x120xf32> -> vector<2x120xf32>
    %c0_18 = arith.constant 0 : index
    %c0_19 = arith.constant 0 : index
    %28 = vector.load %arg7[%c0_18, %c0_19] : memref<1x120xf32, #tpu.memory_space<vmem>>, vector<1x120xf32>
    %29 = vector.broadcast %28 : vector<1x120xf32> to vector<2x120xf32>
    %30 = arith.addf %27, %29 : vector<2x120xf32>
    %cst_20 = arith.constant 0.000000e+00 : f32
    %31 = vector.broadcast %cst_20 : f32 to vector<2x120xf32>
    %32 = arith.maximumf %30, %31 : vector<2x120xf32>
    %c0_21 = arith.constant 0 : index
    %c0_22 = arith.constant 0 : index
    %33 = vector.load %arg8[%c0_21, %c0_22] : memref<128x40xf32, #tpu.memory_space<vmem>>, vector<128x40xf32>
    %cst_23 = arith.constant dense<0.000000e+00> : vector<2x40xf32>
    %34 = tpu.matmul %25, %33, %cst_23 {dimension_numbers = #tpu.dot_dimension_numbers<[1], [0], [0], [1], [0, 0, 1, 1], [], []>} : vector<2x128xf32>, vector<128x40xf32>, vector<2x40xf32> -> vector<2x40xf32>
    %c0_24 = arith.constant 0 : index
    %c0_25 = arith.constant 0 : index
    %35 = vector.load %arg9[%c0_24, %c0_25] : memref<1x40xf32, #tpu.memory_space<vmem>>, vector<1x40xf32>
    %36 = vector.broadcast %35 : vector<1x40xf32> to vector<2x40xf32>
    %37 = arith.addf %34, %36 : vector<2x40xf32>
    %cst_26 = arith.constant 0.000000e+00 : f32
    %38 = vector.broadcast %cst_26 : f32 to vector<2x40xf32>
    %39 = arith.maximumf %37, %38 : vector<2x40xf32>
    %c0_27 = arith.constant 0 : index
    %c0_28 = arith.constant 0 : index
    %40 = vector.load %arg10[%c0_27, %c0_28] : memref<120x128xf32, #tpu.memory_space<vmem>>, vector<120x128xf32>
    %cst_29 = arith.constant dense<0.000000e+00> : vector<2x128xf32>
    %41 = tpu.matmul %32, %40, %cst_29 {dimension_numbers = #tpu.dot_dimension_numbers<[1], [0], [0], [1], [0, 0, 1, 1], [], []>} : vector<2x120xf32>, vector<120x128xf32>, vector<2x128xf32> -> vector<2x128xf32>
    %c0_30 = arith.constant 0 : index
    %c0_31 = arith.constant 0 : index
    %42 = vector.load %arg11[%c0_30, %c0_31] : memref<40x128xf32, #tpu.memory_space<vmem>>, vector<40x128xf32>
    %cst_32 = arith.constant dense<0.000000e+00> : vector<2x128xf32>
    %43 = tpu.matmul %39, %42, %cst_32 {dimension_numbers = #tpu.dot_dimension_numbers<[1], [0], [0], [1], [0, 0, 1, 1], [], []>} : vector<2x40xf32>, vector<40x128xf32>, vector<2x128xf32> -> vector<2x128xf32>
    %44 = arith.addf %41, %43 : vector<2x128xf32>
    %c0_33 = arith.constant 0 : index
    %c0_34 = arith.constant 0 : index
    %45 = vector.load %arg12[%c0_33, %c0_34] : memref<1x128xf32, #tpu.memory_space<vmem>>, vector<1x128xf32>
    %46 = vector.broadcast %45 : vector<1x128xf32> to vector<2x128xf32>
    %47 = arith.addf %44, %46 : vector<2x128xf32>
    %cst_35 = arith.constant 0.000000e+00 : f32
    %48 = vector.broadcast %cst_35 : f32 to vector<2x128xf32>
    %49 = arith.maximumf %47, %48 : vector<2x128xf32>
    %c0_36 = arith.constant 0 : index
    %c0_37 = arith.constant 0 : index
    %50 = vector.load %arg13[%c0_36, %c0_37] : memref<128x2xf32, #tpu.memory_space<vmem>>, vector<128x2xf32>
    %cst_38 = arith.constant dense<0.000000e+00> : vector<2x2xf32>
    %51 = tpu.matmul %49, %50, %cst_38 {dimension_numbers = #tpu.dot_dimension_numbers<[1], [0], [0], [1], [0, 0, 1, 1], [], []>} : vector<2x128xf32>, vector<128x2xf32>, vector<2x2xf32> -> vector<2x2xf32>
    %c0_39 = arith.constant 0 : index
    %c0_40 = arith.constant 0 : index
    %52 = vector.load %arg14[%c0_39, %c0_40] : memref<1x2xf32, #tpu.memory_space<vmem>>, vector<1x2xf32>
    %53 = vector.broadcast %52 : vector<1x2xf32> to vector<2x2xf32>
    %54 = arith.addf %51, %53 : vector<2x2xf32>
    %cst_41 = arith.constant dense<0xFF800000> : vector<2xf32>
    %55 = vector.multi_reduction <maximumf>, %54, %cst_41 [1] : vector<2x2xf32> to vector<2xf32>
    %56 = vector.shape_cast %55 : vector<2xf32> to vector<2x1xf32>
    %57 = vector.broadcast %56 : vector<2x1xf32> to vector<2x2xf32>
    %58 = arith.subf %54, %57 : vector<2x2xf32>
    %59 = math.exp %58 : vector<2x2xf32>
    %cst_42 = arith.constant dense<0.000000e+00> : vector<2xf32>
    %60 = vector.multi_reduction <add>, %59, %cst_42 [1] : vector<2x2xf32> to vector<2xf32>
    %61 = vector.shape_cast %60 : vector<2xf32> to vector<2x1xf32>
    %62 = vector.broadcast %61 : vector<2x1xf32> to vector<2x2xf32>
    %63 = arith.divf %59, %62 : vector<2x2xf32>
    %c0_43 = arith.constant 0 : index
    %c0_44 = arith.constant 0 : index
    %64 = vector.load %arg15[%c0_43, %c0_44] : memref<2x2xf32, #tpu.memory_space<vmem>>, vector<2x2xf32>
    tpu.vector_store %arg15[%c0_43, %c0_44], %63 {strides = array<i32>} : memref<2x2xf32, #tpu.memory_space<vmem>>, vector<2x2xf32>,
    return
  }
}

</mosaic_0001>

<bundles_post_ra>
// kernel: inception_network_forward.1
= control target key start
LH: loop header
LB: loop body
LE: loop exit
PB: predicated region body
PF: predicated region fallthrough
CT: control target
= control target key end

     0   :  { %20 = vsyncpa [#allocation3], 0  ;;  %s2695_s0 = inlined_call_operand.vmem [shape: f32[2,128], index: 0, kind: input, shape index: {}]   ;;  %s2696_s1 = inlined_call_operand.vmem [shape: f32[128,512], index: 1, kind: input, shape index: {}]   ;;  %s2697_s2 = inlined_call_operand.vmem [shape: f32[1,256], index: 2, kind: input, shape index: {}]   ;;  %s2698_s3 = inlined_call_operand.hbm [shape: f32[256,384], index: 3, kind: input, shape index: {}]   ;;  %s2699_s4 = inlined_call_operand.hbm [shape: f32[256,384], index: 4, kind: input, shape index: {}]   ;;  %s2700_s5 = inlined_call_operand.vmem [shape: f32[1,384], index: 5, kind: input, shape index: {}]   ;;  %s2701_s6 = inlined_call_operand.vmem [shape: f32[128,120], index: 6, kind: input, shape index: {}]   ;;  %s2702_s7 = inlined_call_operand.vmem [shape: f32[1,120], index: 7, kind: input, shape index: {}]   ;;  %s2703_s8 = inlined_call_operand.vmem [shape: f32[128,40], index: 8, kind: input, shape index: {}]   ;;  %s2704_s9 = inlined_call_operand.vmem [shape: f32[1,40], index: 9, kind: input, shape index: {}]   ;;  %s2705_s10 = inlined_call_operand.hbm [shape: f32[120,128], index: 10, kind: input, shape index: {}]   ;;  %s2706_s11 = inlined_call_operand.hbm [shape: f32[40,128], index: 11, kind: input, shape index: {}]   ;;  %s2707_s12 = inlined_call_operand.vmem [shape: f32[1,128], index: 12, kind: input, shape index: {}]   ;;  %s2708_s13 = inlined_call_operand.vmem [shape: f32[128,2], index: 13, kind: input, shape index: {}]   ;;  %s2709_s14 = inlined_call_operand.vmem [shape: f32[1,2], index: 14, kind: input, shape index: {}]   ;;  %s2710_s15 = inlined_call_operand.hbm [shape: f32[2,2], index: 15, kind: output, shape index: {}]  }
   0x1   :  { %21 = vsyncpa [#allocation6], 0 }
   0x2   :  { %22 = vsyncpa [#allocation9], 0 }
   0x3   :  { %23 = vsyncpa [#allocation4], 0  ;;  %s2110_s18 = smov [#allocation5]   ;;  %s2111_s20 = smov [#allocation2]  }
   0x4   :  { %s47_s19 = sshll.u32 %s2110_s18, 4  ;;  %s35_s21 = sshll.u32 %s2111_s20, 4  ;;  %s48_s19 = int_to_ptr.vmem [resolvable:$true] %s47_s19  ;;  %s2202_s21 = int_to_ptr.vmem [resolvable:$true] %s35_s21 }
   0x5   :  { %s1992_s24 = scalar_lea.hbm %s2699_s4, 12288 }
   0x6   :  { %p1993_p0 = scmp.ne.s32.totalorder %s2699_s4, %s1992_s24  ;;  %p1996_p1 = scmp.lt.u32.totalorder %s1992_s24, %s2699_s4 }
   0x8   :  { %p1998_p2 = pnand %p1996_p1, %p1993_p0 }
   0xa   :  { %2001 = shalt.err (!%p1998_p2)
}
   0xb   :  { %s2002_s29 = scalar_lea.vmem %s48_s19, 12288  ;;  %p2007_p4 = scmp.lt.s32.totalorder %s48_s19, %s48_s19 }
   0xc   :  { %p2003_p3 = scmp.ne.s32.totalorder %s48_s19, %s2002_s29  ;;  %p2008_p5 = scmp.lt.s32.totalorder %s2002_s29, %s2002_s29 }
   0xe   :  { %p2009_p6 = por %p2008_p5, %p2007_p4 }
  0x10   :  { %p2010_p7 = pnand %p2009_p6, %p2003_p3 }
  0x12   :  { %2013 = shalt.err (!%p2010_p7)
}
  0x13   :  { %s2112_s30 = smov 384   ;;  %s2113_s16 = smov 24  }
  0x14   :  { %53 = dma.hbm_to_vmem [thread:$0]  %s2699_s4, 12288, %s48_s19, [#allocation6], %s2112_s30, %s2112_s30, %s2113_s16  }
  0x15   :  { %s2014_s23 = scalar_lea.hbm %s2698_s3, 12288 }
  0x16   :  { %p2015_p8 = scmp.ne.s32.totalorder %s2698_s3, %s2014_s23  ;;  %p2018_p9 = scmp.lt.u32.totalorder %s2014_s23, %s2698_s3 }
  0x18   :  { %p2020_p10 = pnand %p2018_p9, %p2015_p8 }
  0x1a   :  { %2023 = shalt.err (!%p2020_p10)
}
  0x1b   :  { %s2024_s28 = scalar_lea.vmem %s2202_s21, 12288  ;;  %p2029_p12 = scmp.lt.s32.totalorder %s2202_s21, %s2202_s21 }
  0x1c   :  { %p2025_p11 = scmp.ne.s32.totalorder %s2202_s21, %s2024_s28  ;;  %p2030_p13 = scmp.lt.s32.totalorder %s2024_s28, %s2024_s28 }
  0x1e   :  { %p2031_p0 = por %p2030_p13, %p2029_p12 }
  0x20   :  { %p2032_p1 = pnand %p2031_p0, %p2025_p11 }
  0x22   :  { %2035 = shalt.err (!%p2032_p1)
}
  0x23   :  { %41 = dma.hbm_to_vmem [thread:$0]  %s2698_s3, 12288, %s2202_s21, [#allocation3], %s2112_s30, %s2112_s30, %s2113_s16  }
  0x24   :  { %s2114_s29 = smov [#allocation7]   ;;  %s2036_s22 = scalar_lea.hbm %s2705_s10, 1920 }
  0x25   :  { %s69_s17 = sshll.u32 %s2114_s29, 4  ;;  %p2037_p2 = scmp.ne.s32.totalorder %s2705_s10, %s2036_s22  ;;  %s70_s17 = int_to_ptr.vmem [resolvable:$true] %s69_s17 }
  0x26   :  { %p2040_p3 = scmp.lt.u32.totalorder %s2036_s22, %s2705_s10 }
  0x28   :  { %p2042_p4 = pnand %p2040_p3, %p2037_p2 }
  0x2a   :  { %2045 = shalt.err (!%p2042_p4)
}
  0x2b   :  { %s2046_s27 = scalar_lea.vmem %s70_s17, 1920  ;;  %p2051_p6 = scmp.lt.s32.totalorder %s70_s17, %s70_s17 }
  0x2c   :  { %p2047_p5 = scmp.ne.s32.totalorder %s70_s17, %s2046_s27  ;;  %p2052_p7 = scmp.lt.s32.totalorder %s2046_s27, %s2046_s27 }
  0x2e   :  { %p2053_p8 = por %p2052_p7, %p2051_p6 }
  0x30   :  { %p2054_p9 = pnand %p2053_p8, %p2047_p5 }
  0x32   :  { %2057 = shalt.err (!%p2054_p9)
}
  0x33   :  { %s2115_s3 = smov 128   ;;  %s2116_s21 = smov 8  }
  0x34   :  { %75 = dma.hbm_to_vmem [thread:$0]  %s2705_s10, 1920, %s70_s17, [#allocation6], %s2115_s3, %s2115_s3, %s2116_s21  }
  0x35   :  { %s2117_s28 = smov [#allocation8]   ;;  %s2058_s18 = scalar_lea.hbm %s2706_s11, 640 }
  0x36   :  { %s81_s4 = sshll.u32 %s2117_s28, 4  ;;  %p2059_p10 = scmp.ne.s32.totalorder %s2706_s11, %s2058_s18  ;;  %s82_s4 = int_to_ptr.vmem [resolvable:$true] %s81_s4 }
  0x37   :  { %p2062_p11 = scmp.lt.u32.totalorder %s2058_s18, %s2706_s11 }
  0x39   :  { %p2064_p12 = pnand %p2062_p11, %p2059_p10 }
  0x3b   :  { %2067 = shalt.err (!%p2064_p12)
}
  0x3c   :  { %s2068_s25 = scalar_lea.vmem %s82_s4, 640  ;;  %p2073_p0 = scmp.lt.s32.totalorder %s82_s4, %s82_s4 }
  0x3d   :  { %p2069_p13 = scmp.ne.s32.totalorder %s82_s4, %s2068_s25  ;;  %p2074_p1 = scmp.lt.s32.totalorder %s2068_s25, %s2068_s25 }
  0x3f   :  { %p2075_p2 = por %p2074_p1, %p2073_p0 }
  0x41   :  { %p2076_p3 = pnand %p2075_p2, %p2069_p13 }
  0x43   :  { %2079 = shalt.err (!%p2076_p3)
}
  0x44   :  { %87 = dma.hbm_to_vmem [thread:$0]  %s2706_s11, 640, %s82_s4, [#allocation9], %s2115_s3, %s2115_s3, %s2116_s21  }
  0x45   :  { %2102 = dma.done.wait [#allocation3], 12288  }
  0x46   :  { %2103 = vsyncadd [#allocation3], 4294955008 }
  0x47   :  { %2104 = dma.done.wait [#allocation6], 14208  }
  0x48   :  { %2105 = vsyncadd [#allocation6], 4294953088 }
  0x49   :  { %2106 = dma.done.wait [#allocation9], 640  }
  0x4a   :  { %2107 = vsyncadd [#allocation9], 4294966656  ;;  %v2118_v0 = vmov 0.0   ;;  %v108_v1 = vld [vmem:[%s2696_s1 + $0x8] sm:$0xff]  ;;  %v110_v3 = vld [vmem:[%s2696_s1 + $0x18] sm:$0xff]  ;;  %vm2120_vm0 = vmmov 0  }
  0x4b   :  { %235 = vmatprep.mubr.f32.mxu0 %v2118_v0  ;;  %306 = vmatprep.mubr.f32.mxu1 %v2118_v0  ;;  %v112_v2 = vld [vmem:[%s2696_s1 + $0x28] sm:$0xff]  ;;  %v114_v5 = vld [vmem:[%s2696_s1 + $0x38] sm:$0xff]  ;;  %v107_v6 = vld [vmem:[%s2696_s1] sm:$0xff]  ;;  %vm1041_vm1 = vcmask 326656   ;;  %vm1115_vm2 = vcmask 982016   ;;  %vm1291_vm3 = vcmask 9216  }
  0x4c   :  { %v1621_v4 = vpack.c.bf16 %v112_v2, %v108_v1  ;;  %v111_v7 = vld [vmem:[%s2696_s1 + $0x20] sm:$0xff]  ;;  %v1653_v8 = vpack.c.bf16 %v114_v5, %v110_v3  ;;  %v109_v10 = vld [vmem:[%s2696_s1 + $0x10] sm:$0xff]  ;;  %v116_v12 = vld [vmem:[%s2696_s1 + $0x48] sm:$0xff] }
  0x4d   :  { %v1623_v9 = vpack.c.bf16 %v111_v7, %v107_v6  ;;  %v113_v11 = vld [vmem:[%s2696_s1 + $0x30] sm:$0xff]  ;;  %v120_v14 = vld [vmem:[%s2696_s1 + $0x68] sm:$0xff]  ;;  %v118_v15 = vld [vmem:[%s2696_s1 + $0x58] sm:$0xff] }
  0x4e   :  { %1622 = vmatprep.subr.bf16.mxu0 %v1621_v4  ;;  %v1655_v13 = vpack.c.bf16 %v113_v11, %v109_v10  ;;  %v122_v16 = vld [vmem:[%s2696_s1 + $0x78] sm:$0xff]  ;;  %1654 = vmatprep.subr.bf16.mxu1 %v1653_v8  ;;  %v1625_v17 = vpack.c.bf16 %v120_v14, %v116_v12  ;;  %v115_v19 = vld [vmem:[%s2696_s1 + $0x40] sm:$0xff]  ;;  %v117_v21 = vld [vmem:[%s2696_s1 + $0x50] sm:$0xff] }
  0x4f   :  { %1624 = vmatpush1.bf16.msra.mxu0 %v1623_v9  ;;  %v1657_v18 = vpack.c.bf16 %v122_v16, %v118_v15  ;;  %v119_v20 = vld [vmem:[%s2696_s1 + $0x60] sm:$0xff]  ;;  %v121_v23 = vld [vmem:[%s2696_s1 + $0x70] sm:$0xff]  ;;  %v124_v24 = vld [vmem:[%s2696_s1 + $0x88] sm:$0xff] }
  0x50   :  { %1656 = vmatpush1.bf16.msra.mxu1 %v1655_v13  ;;  %v1627_v22 = vpack.c.bf16 %v119_v20, %v115_v19  ;;  %v128_v25 = vld [vmem:[%s2696_s1 + $0xa8] sm:$0xff]  ;;  %1626 = vmatprep.subr.bf16.mxu0 %v1625_v17  ;;  %v1659_v26 = vpack.c.bf16 %v121_v23, %v117_v21  ;;  %v126_v28 = vld [vmem:[%s2696_s1 + $0x98] sm:$0xff]  ;;  %v123_v30 = vld [vmem:[%s2696_s1 + $0x80] sm:$0xff] }
  0x51   :  { %1658 = vmatprep.subr.bf16.mxu1 %v1657_v18  ;;  %v1629_v27 = vpack.c.bf16 %v128_v25, %v124_v24  ;;  %v130_v29 = vld [vmem:[%s2696_s1 + $0xb8] sm:$0xff]  ;;  %v127_v32 = vld [vmem:[%s2696_s1 + $0xa0] sm:$0xff]  ;;  %v125_v33 = vld [vmem:[%s2696_s1 + $0x90] sm:$0xff] }
  0x52   :  { %v1661_v31 = vpack.c.bf16 %v130_v29, %v126_v28  ;;  %v129_v34 = vld [vmem:[%s2696_s1 + $0xb0] sm:$0xff]  ;;  %v1631_v35 = vpack.c.bf16 %v127_v32, %v123_v30  ;;  %v132_v36 = vld [vmem:[%s2696_s1 + $0xc8] sm:$0xff]  ;;  %v134_v38 = vld [vmem:[%s2696_s1 + $0xd8] sm:$0xff] }
  0x53   :  { %1628 = vmatpush1.bf16.msra.mxu0 %v1627_v22  ;;  %v136_v37 = vld [vmem:[%s2696_s1 + $0xe8] sm:$0xff]  ;;  %v1663_v39 = vpack.c.bf16 %v129_v34, %v125_v33  ;;  %v138_v41 = vld [vmem:[%s2696_s1 + $0xf8] sm:$0xff]  ;;  %v131_v42 = vld [vmem:[%s2696_s1 + $0xc0] sm:$0xff] }
  0x54   :  { %1660 = vmatpush1.bf16.msra.mxu1 %v1659_v26  ;;  %1630 = vmatprep.subr.bf16.mxu0 %v1629_v27  ;;  %v1633_v40 = vpack.c.bf16 %v136_v37, %v132_v36  ;;  %v135_v43 = vld [vmem:[%s2696_s1 + $0xe0] sm:$0xff]  ;;  %v1665_v44 = vpack.c.bf16 %v138_v41, %v134_v38  ;;  %v133_v45 = vld [vmem:[%s2696_s1 + $0xd0] sm:$0xff]  ;;  %v140_v47 = vld [vmem:[%s2696_s1 + $0x108] sm:$0xff] }
  0x55   :  { %1662 = vmatprep.subr.bf16.mxu1 %v1661_v31  ;;  %v137_v46 = vld [vmem:[%s2696_s1 + $0xf0] sm:$0xff]  ;;  %v144_v48 = vld [vmem:[%s2696_s1 + $0x128] sm:$0xff]  ;;  %v142_v49 = vld [vmem:[%s2696_s1 + $0x118] sm:$0xff]  ;;  %v1635_v51 = vpack.c.bf16 %v135_v43, %v131_v42 }
  0x56   :  { %v146_v50 = vld [vmem:[%s2696_s1 + $0x138] sm:$0xff]  ;;  %v1667_v52 = vpack.c.bf16 %v137_v46, %v133_v45  ;;  %v1637_v53 = vpack.c.bf16 %v144_v48, %v140_v47  ;;  %v139_v54 = vld [vmem:[%s2696_s1 + $0x100] sm:$0xff]  ;;  %v141_v56 = vld [vmem:[%s2696_s1 + $0x110] sm:$0xff] }
  0x57   :  { %1632 = vmatpush1.bf16.msra.mxu0 %v1631_v35  ;;  %v143_v55 = vld [vmem:[%s2696_s1 + $0x120] sm:$0xff]  ;;  %v1669_v57 = vpack.c.bf16 %v146_v50, %v142_v49  ;;  %v145_v58 = vld [vmem:[%s2696_s1 + $0x130] sm:$0xff]  ;;  %v148_v59 = vld [vmem:[%s2696_s1 + $0x148] sm:$0xff] }
  0x58   :  { %1664 = vmatpush1.bf16.msra.mxu1 %v1663_v39  ;;  %1634 = vmatprep.subr.bf16.mxu0 %v1633_v40  ;;  %v152_v60 = vld [vmem:[%s2696_s1 + $0x168] sm:$0xff]  ;;  %v150_v61 = vld [vmem:[%s2696_s1 + $0x158] sm:$0xff]  ;;  %v1639_v63 = vpack.c.bf16 %v143_v55, %v139_v54  ;;  %v1671_v1 = vpack.c.bf16 %v145_v58, %v141_v56  ;;  %v147_v3 = vld [vmem:[%s2696_s1 + $0x140] sm:$0xff] }
  0x59   :  { %1666 = vmatprep.subr.bf16.mxu1 %v1665_v44  ;;  %v154_v62 = vld [vmem:[%s2696_s1 + $0x178] sm:$0xff]  ;;  %v1641_v2 = vpack.c.bf16 %v152_v60, %v148_v59  ;;  %v151_v4 = vld [vmem:[%s2696_s1 + $0x160] sm:$0xff]  ;;  %v149_v5 = vld [vmem:[%s2696_s1 + $0x150] sm:$0xff] }
  0x5a   :  { %v1673_v6 = vpack.c.bf16 %v154_v62, %v150_v61  ;;  %v153_v7 = vld [vmem:[%s2696_s1 + $0x170] sm:$0xff]  ;;  %v156_v8 = vld [vmem:[%s2696_s1 + $0x188] sm:$0xff]  ;;  %v158_v10 = vld [vmem:[%s2696_s1 + $0x198] sm:$0xff]  ;;  %v1643_v12 = vpack.c.bf16 %v151_v4, %v147_v3 }
  0x5b   :  { %1636 = vmatpush1.bf16.msra.mxu0 %v1635_v51  ;;  %v160_v9 = vld [vmem:[%s2696_s1 + $0x1a8] sm:$0xff]  ;;  %v162_v11 = vld [vmem:[%s2696_s1 + $0x1b8] sm:$0xff]  ;;  %v1675_v13 = vpack.c.bf16 %v153_v7, %v149_v5  ;;  %v155_v15 = vld [vmem:[%s2696_s1 + $0x180] sm:$0xff] }
  0x5c   :  { %1668 = vmatpush1.bf16.msra.mxu1 %v1667_v52  ;;  %1638 = vmatprep.subr.bf16.mxu0 %v1637_v53  ;;  %v1645_v14 = vpack.c.bf16 %v160_v9, %v156_v8  ;;  %v159_v16 = vld [vmem:[%s2696_s1 + $0x1a0] sm:$0xff]  ;;  %v157_v17 = vld [vmem:[%s2696_s1 + $0x190] sm:$0xff]  ;;  %v1677_v18 = vpack.c.bf16 %v162_v11, %v158_v10  ;;  %v164_v20 = vld [vmem:[%s2696_s1 + $0x1c8] sm:$0xff] }
  0x5d   :  { %1670 = vmatprep.subr.bf16.mxu1 %v1669_v57  ;;  %v161_v19 = vld [vmem:[%s2696_s1 + $0x1b0] sm:$0xff]  ;;  %v168_v21 = vld [vmem:[%s2696_s1 + $0x1e8] sm:$0xff]  ;;  %v166_v22 = vld [vmem:[%s2696_s1 + $0x1d8] sm:$0xff]  ;;  %v1647_v24 = vpack.c.bf16 %v159_v16, %v155_v15 }
  0x5e   :  { %v170_v23 = vld [vmem:[%s2696_s1 + $0x1f8] sm:$0xff]  ;;  %v1679_v25 = vpack.c.bf16 %v161_v19, %v157_v17  ;;  %v1649_v26 = vpack.c.bf16 %v168_v21, %v164_v20  ;;  %v163_v27 = vld [vmem:[%s2696_s1 + $0x1c0] sm:$0xff]  ;;  %v165_v29 = vld [vmem:[%s2696_s1 + $0x1d0] sm:$0xff] }
  0x5f   :  { %1640 = vmatpush1.bf16.msra.mxu0 %v1639_v63  ;;  %v167_v28 = vld [vmem:[%s2696_s1 + $0x1e0] sm:$0xff]  ;;  %v1681_v30 = vpack.c.bf16 %v170_v23, %v166_v22  ;;  %v169_v31 = vld [vmem:[%s2696_s1 + $0x1f0] sm:$0xff]  ;;  %v332_v32 = vld [vmem:[#allocation2 + $0x8] sm:$0xff] }
  0x60   :  { %1672 = vmatpush1.bf16.msra.mxu1 %v1671_v1  ;;  %1642 = vmatprep.subr.bf16.mxu0 %v1641_v2  ;;  %v335_v33 = vld [vmem:[#allocation2 + $0x20] sm:$0xff]  ;;  %v1651_v34 = vpack.c.bf16 %v167_v28, %v163_v27  ;;  %v1683_v35 = vpack.c.bf16 %v169_v31, %v165_v29  ;;  %v334_v38 = vld [vmem:[#allocation2 + $0x18] sm:$0xff]  ;;  %v341_v40 = vld [vmem:[#allocation2 + $0x50] sm:$0xff] }
  0x61   :  { %1674 = vmatprep.subr.bf16.mxu1 %v1673_v6  ;;  %v1685_v36 = vpack.c.bf16 %v335_v33, %v332_v32  ;;  %v331_v37 = vld [vmem:[#allocation2] sm:$0xff]  ;;  %v338_v39 = vld [vmem:[#allocation2 + $0x38] sm:$0xff]  ;;  %v337_v43 = vld [vmem:[#allocation2 + $0x30] sm:$0xff] }
  0x62   :  { %v106_v41 = vld [vmem:[%s2695_s0] sm:$0x3]  ;;  %v1687_v42 = vpack.c.bf16 %v334_v38, %v331_v37  ;;  %v340_v44 = vld [vmem:[#allocation2 + $0x48] sm:$0xff]  ;;  %v1689_v45 = vpack.c.bf16 %v341_v40, %v338_v39  ;;  %v381_v47 = vld [vmem:[#allocation2 + $0x190] sm:$0xff] }
  0x63   :  { %1644 = vmatpush1.bf16.msra.mxu0 %v1643_v12  ;;  %v344_v46 = vld [vmem:[#allocation2 + $0x68] sm:$0xff]  ;;  %v347_v49 = vld [vmem:[#allocation2 + $0x80] sm:$0xff]  ;;  %v333_v51 = vld [vmem:[#allocation2 + $0x10] sm:$0xff]  ;;  %v1691_v55 = vpack.c.bf16 %v340_v44, %v337_v43 }
  0x64   :  { %1676 = vmatpush1.bf16.msra.mxu1 %v1675_v13  ;;  %1646 = vmatprep.subr.bf16.mxu0 %v1645_v14  ;;  %v384_v48 = vld [vmem:[#allocation2 + $0x1a8] sm:$0xff]  ;;  %v387_v54 = vld [vmem:[#allocation2 + $0x1c0] sm:$0xff]  ;;  %v346_v57 = vld [vmem:[#allocation2 + $0x78] sm:$0xff]  ;;  %v1693_v59 = vpack.c.bf16 %v347_v49, %v344_v46 }
  0x65   :  { %1678 = vmatprep.subr.bf16.mxu1 %v1677_v18  ;;  %v1749_v50 = vpack.c.bf16 %v384_v48, %v381_v47  ;;  %v336_v52 = vld [vmem:[#allocation2 + $0x28] sm:$0xff]  ;;  %v343_v56 = vld [vmem:[#allocation2 + $0x60] sm:$0xff]  ;;  %v390_v58 = vld [vmem:[#allocation2 + $0x1d8] sm:$0xff] }
  0x66   :  { %v1751_v53 = vpack.c.bf16 %v336_v52, %v333_v51  ;;  %v350_v60 = vld [vmem:[#allocation2 + $0x98] sm:$0xff]  ;;  %v1753_v61 = vpack.c.bf16 %v390_v58, %v387_v54  ;;  %v339_v62 = vld [vmem:[#allocation2 + $0x40] sm:$0xff]  ;;  %v353_v1 = vld [vmem:[#allocation2 + $0xb0] sm:$0xff]  ;;  %v1695_v7 = vpack.c.bf16 %v346_v57, %v343_v56 }
  0x67   :  { %1648 = vmatpush1.bf16.msra.mxu0 %v1647_v24  ;;  %v342_v63 = vld [vmem:[#allocation2 + $0x58] sm:$0xff]  ;;  %v393_v3 = vld [vmem:[#allocation2 + $0x1f0] sm:$0xff]  ;;  %v396_v4 = vld [vmem:[#allocation2 + $0x208] sm:$0xff]  ;;  %v1697_v10 = vpack.c.bf16 %v353_v1, %v350_v60 }
  0x68   :  { %1680 = vmatpush1.bf16.msra.mxu1 %v1679_v25  ;;  %1650 = vmatprep.subr.bf16.mxu0 %v1649_v26  ;;  %v1755_v2 = vpack.c.bf16 %v342_v63, %v339_v62  ;;  %v1757_v5 = vpack.c.bf16 %v396_v4, %v393_v3  ;;  %v345_v6 = vld [vmem:[#allocation2 + $0x70] sm:$0xff]  ;;  %v348_v9 = vld [vmem:[#allocation2 + $0x88] sm:$0xff]  ;;  %v399_v12 = vld [vmem:[#allocation2 + $0x220] sm:$0xff] }
  0x69   :  { %1682 = vmatprep.subr.bf16.mxu1 %v1681_v30  ;;  %v349_v8 = vld [vmem:[#allocation2 + $0x90] sm:$0xff]  ;;  %v352_v11 = vld [vmem:[#allocation2 + $0xa8] sm:$0xff]  ;;  %v402_v13 = vld [vmem:[#allocation2 + $0x238] sm:$0xff]  ;;  %v1759_v16 = vpack.c.bf16 %v348_v9, %v345_v6 }
  0x6a   :  { %v356_v14 = vld [vmem:[#allocation2 + $0xc8] sm:$0xff]  ;;  %v359_v15 = vld [vmem:[#allocation2 + $0xe0] sm:$0xff]  ;;  %v1761_v17 = vpack.c.bf16 %v402_v13, %v399_v12  ;;  %v354_v19 = vld [vmem:[#allocation2 + $0xb8] sm:$0xff]  ;;  %v1699_v20 = vpack.c.bf16 %v352_v11, %v349_v8 }
  0x6b   :  { %1652 = vmatpush1.bf16.msra.mxu0 %v1651_v34  ;;  %v351_v18 = vld [vmem:[#allocation2 + $0xa0] sm:$0xff]  ;;  %v405_v21 = vld [vmem:[#allocation2 + $0x250] sm:$0xff]  ;;  %v408_v22 = vld [vmem:[#allocation2 + $0x268] sm:$0xff]  ;;  %v1701_v23 = vpack.c.bf16 %v359_v15, %v356_v14 }
  0x6c   :  { %1684 = vmatpush1.bf16.msra.mxu1 %v1683_v35  ;;  %1686 = vmatprep.subr.bf16.mxu0 %v1685_v36  ;;  %v355_v24 = vld [vmem:[#allocation2 + $0xc0] sm:$0xff]  ;;  %v358_v25 = vld [vmem:[#allocation2 + $0xd8] sm:$0xff]  ;;  %v365_v27 = vld [vmem:[#allocation2 + $0x110] sm:$0xff]  ;;  %v1763_v28 = vpack.c.bf16 %v354_v19, %v351_v18  ;;  %v1765_v29 = vpack.c.bf16 %v408_v22, %v405_v21 }
  0x6d   :  { %1750 = vmatprep.subr.bf16.mxu1 %v1749_v50  ;;  %v362_v26 = vld [vmem:[#allocation2 + $0xf8] sm:$0xff]  ;;  %v357_v30 = vld [vmem:[#allocation2 + $0xd0] sm:$0xff]  ;;  %v360_v31 = vld [vmem:[#allocation2 + $0xe8] sm:$0xff]  ;;  %v1703_v32 = vpack.c.bf16 %v358_v25, %v355_v24 }
  0x6e   :  { %236 = vmatmul.mubr.f32.vlgmr.msra.gmra.mrb[0].mxu0 %v106_v41  ;;  %v411_v33 = vld [vmem:[#allocation2 + $0x280] sm:$0xff]  ;;  %v414_v34 = vld [vmem:[#allocation2 + $0x298] sm:$0xff]  ;;  %v1705_v35 = vpack.c.bf16 %v365_v27, %v362_v26  ;;  %v361_v36 = vld [vmem:[#allocation2 + $0xf0] sm:$0xff]  ;;  %v1767_v40 = vpack.c.bf16 %v360_v31, %v357_v30 }
  0x6f   :  { %307 = vmatmul.mubr.f32.vlgmr.msra.gmra.mrb[0].mxu1 %v106_v41  ;;  %1688 = vmatpush1.bf16.msra.mxu0 %v1687_v42  ;;  %v364_v37 = vld [vmem:[#allocation2 + $0x108] sm:$0xff]  ;;  %v371_v39 = vld [vmem:[#allocation2 + $0x140] sm:$0xff]  ;;  %v1769_v41 = vpack.c.bf16 %v414_v34, %v411_v33  ;;  %v366_v43 = vld [vmem:[#allocation2 + $0x118] sm:$0xff] }
  0x70   :  { %1690 = vmatprep.subr.bf16.mxu0 %v1689_v45  ;;  %1752 = vmatpush3.bf16.msra.mxu1 %v1751_v53  ;;  %v368_v38 = vld [vmem:[#allocation2 + $0x128] sm:$0xff]  ;;  %v363_v42 = vld [vmem:[#allocation2 + $0x100] sm:$0xff]  ;;  %v1707_v44 = vpack.c.bf16 %v364_v37, %v361_v36  ;;  %v370_v47 = vld [vmem:[#allocation2 + $0x138] sm:$0xff] }
  0x71   :  { %1754 = vmatprep.subr.bf16.mxu1 %v1753_v61  ;;  %v1709_v45 = vpack.c.bf16 %v371_v39, %v368_v38  ;;  %v367_v46 = vld [vmem:[#allocation2 + $0x120] sm:$0xff]  ;;  %v374_v48 = vld [vmem:[#allocation2 + $0x158] sm:$0xff]  ;;  %v377_v49 = vld [vmem:[#allocation2 + $0x170] sm:$0xff]  ;;  %v1771_v50 = vpack.c.bf16 %v366_v43, %v363_v42 }
  0x72   :  { %v1711_v51 = vpack.c.bf16 %v370_v47, %v367_v46  ;;  %v1713_v52 = vpack.c.bf16 %v377_v49, %v374_v48  ;;  %v373_v53 = vld [vmem:[#allocation2 + $0x150] sm:$0xff]  ;;  %v376_v54 = vld [vmem:[#allocation2 + $0x168] sm:$0xff]  ;;  %v383_v56 = vld [vmem:[#allocation2 + $0x1a0] sm:$0xff] }
  0x73   :  { %1692 = vmatpush1.bf16.msra.mxu0 %v1691_v55  ;;  %v380_v55 = vld [vmem:[#allocation2 + $0x188] sm:$0xff]  ;;  %v1715_v57 = vpack.c.bf16 %v376_v54, %v373_v53  ;;  %v382_v60 = vld [vmem:[#allocation2 + $0x198] sm:$0xff]  ;;  %v389_v62 = vld [vmem:[#allocation2 + $0x1d0] sm:$0xff] }
  0x74   :  { %1694 = vmatprep.subr.bf16.mxu0 %v1693_v59  ;;  %1756 = vmatpush3.bf16.msra.mxu1 %v1755_v2  ;;  %v1717_v58 = vpack.c.bf16 %v383_v56, %v380_v55  ;;  %v379_v59 = vld [vmem:[#allocation2 + $0x180] sm:$0xff]  ;;  %v386_v61 = vld [vmem:[#allocation2 + $0x1b8] sm:$0xff]  ;;  %v385_v2 = vld [vmem:[#allocation2 + $0x1b0] sm:$0xff] }
  0x75   :  { %1758 = vmatprep.subr.bf16.mxu1 %v1757_v5  ;;  %v1719_v63 = vpack.c.bf16 %v382_v60, %v379_v59  ;;  %v1721_v1 = vpack.c.bf16 %v389_v62, %v386_v61  ;;  %v388_v3 = vld [vmem:[#allocation2 + $0x1c8] sm:$0xff]  ;;  %v395_v5 = vld [vmem:[#allocation2 + $0x200] sm:$0xff]  ;;  %v394_v9 = vld [vmem:[#allocation2 + $0x1f8] sm:$0xff]  ;;  %v317_v59 = vlaneseq }
  0x76   :  { %v392_v4 = vld [vmem:[#allocation2 + $0x1e8] sm:$0xff]  ;;  %v1723_v6 = vpack.c.bf16 %v388_v3, %v385_v2  ;;  %v391_v8 = vld [vmem:[#allocation2 + $0x1e0] sm:$0xff]  ;;  %v401_v11 = vld [vmem:[#allocation2 + $0x230] sm:$0xff] }
  0x77   :  { %1696 = vmatpush1.bf16.msra.mxu0 %v1695_v7  ;;  %v1725_v7 = vpack.c.bf16 %v395_v5, %v392_v4  ;;  %v1727_v12 = vpack.c.bf16 %v394_v9, %v391_v8  ;;  %v397_v14 = vld [vmem:[#allocation2 + $0x210] sm:$0xff]  ;;  %v400_v15 = vld [vmem:[#allocation2 + $0x228] sm:$0xff]  ;;  %v406_v21 = vld [vmem:[#allocation2 + $0x258] sm:$0xff]  ;;  %v2454_v60 = vshrl.u32 %v317_v59, 7 }
  0x78   :  { %1698 = vmatprep.subr.bf16.mxu0 %v1697_v10  ;;  %1760 = vmatpush3.bf16.msra.mxu1 %v1759_v16  ;;  %v398_v10 = vld [vmem:[#allocation2 + $0x218] sm:$0xff]  ;;  %v404_v16 = vld [vmem:[#allocation2 + $0x248] sm:$0xff]  ;;  %v1731_v18 = vpack.c.bf16 %v400_v15, %v397_v14  ;;  %v409_v26 = vld [vmem:[#allocation2 + $0x270] sm:$0xff] }
  0x79   :  { %1762 = vmatprep.subr.bf16.mxu1 %v1761_v17  ;;  %v1729_v13 = vpack.c.bf16 %v401_v11, %v398_v10  ;;  %v407_v17 = vld [vmem:[#allocation2 + $0x260] sm:$0xff]  ;;  %v410_v22 = vld [vmem:[#allocation2 + $0x278] sm:$0xff]  ;;  %v412_v27 = vld [vmem:[#allocation2 + $0x288] sm:$0xff]  ;;  %v319_v61 = vsub.s32 0, %v2454_v60 }
  0x7a   :  { %v1733_v19 = vpack.c.bf16 %v407_v17, %v404_v16  ;;  %v419_v30 = vld [vmem:[#allocation2 + $0x2c0] sm:$0xff]  ;;  %v417_v31 = vld [vmem:[#allocation2 + $0x2b0] sm:$0xff]  ;;  %v420_v33 = vld [vmem:[#allocation2 + $0x2c8] sm:$0xff] }
  0x7b   :  { %1700 = vmatpush1.bf16.msra.mxu0 %v1699_v20  ;;  %v403_v20 = vld [vmem:[#allocation2 + $0x240] sm:$0xff]  ;;  %v1773_v36 = vpack.c.bf16 %v420_v33, %v417_v31  ;;  %v369_v38 = vld [vmem:[#allocation2 + $0x130] sm:$0xff]  ;;  %v372_v39 = vld [vmem:[#allocation2 + $0x148] sm:$0xff] }
  0x7c   :  { %1702 = vmatprep.subr.bf16.mxu0 %v1701_v23  ;;  %1764 = vmatpush3.bf16.msra.mxu1 %v1763_v28  ;;  %v413_v23 = vld [vmem:[#allocation2 + $0x290] sm:$0xff]  ;;  %v1735_v24 = vpack.c.bf16 %v406_v21, %v403_v20  ;;  %v1739_v28 = vpack.c.bf16 %v412_v27, %v409_v26  ;;  %v415_v34 = vld [vmem:[#allocation2 + $0x2a0] sm:$0xff]  ;;  %v424_v47 = vld [vmem:[#allocation2 + $0x2e8] sm:$0xff] }
  0x7d   :  { %1766 = vmatprep.subr.bf16.mxu1 %v1765_v29  ;;  %v1737_v25 = vpack.c.bf16 %v413_v23, %v410_v22  ;;  %v416_v29 = vld [vmem:[#allocation2 + $0x2a8] sm:$0xff]  ;;  %v425_v42 = vld [vmem:[#allocation2 + $0x2f0] sm:$0xff]  ;;  %v423_v43 = vld [vmem:[#allocation2 + $0x2e0] sm:$0xff] }
  0x7e   :  { %v421_v46 = vld [vmem:[#allocation2 + $0x2d0] sm:$0xff]  ;;  %v569_v53 = vld [vmem:[#allocation5 + $0x8] sm:$0xff]  ;;  %v572_v54 = vld [vmem:[#allocation5 + $0x20] sm:$0xff] }
  0x7f   :  { %1704 = vmatpush1.bf16.msra.mxu0 %v1703_v32  ;;  %v1741_v32 = vpack.c.bf16 %v419_v30, %v416_v29  ;;  %v1747_v49 = vpack.c.bf16 %v424_v47, %v421_v46  ;;  %v618_v55 = vld [vmem:[#allocation5 + $0x190] sm:$0xff]  ;;  %v1781_v56 = vpack.c.bf16 %v572_v54, %v569_v53  ;;  %v315_v62 = vld [vmem:[%s2697_s2] sm:$0x3]  ;;  %v571_v11 = vld [vmem:[#allocation5 + $0x18] sm:$0xff] }
  0x80   :  { %1706 = vmatprep.subr.bf16.mxu0 %v1705_v35  ;;  %1768 = vmatpush3.bf16.msra.mxu1 %v1767_v40  ;;  %v418_v35 = vld [vmem:[#allocation2 + $0x2b8] sm:$0xff]  ;;  %v1775_v40 = vpack.c.bf16 %v372_v39, %v369_v38  ;;  %v320_v2 = vrot.slane %v315_v62, %v319_v61  ;;  %v568_v9 = vld [vmem:[#allocation5] sm:$0xff]  ;;  %v578_v16 = vld [vmem:[#allocation5 + $0x50] sm:$0xff] }
  0x81   :  { %1770 = vmatprep.subr.bf16.mxu1 %v1769_v41  ;;  %v1743_v37 = vpack.c.bf16 %v418_v35, %v415_v34  ;;  %v422_v41 = vld [vmem:[#allocation2 + $0x2d8] sm:$0xff]  ;;  %v624_v17 = vld [vmem:[#allocation5 + $0x1c0] sm:$0xff]  ;;  %v1783_v20 = vpack.c.bf16 %v571_v11, %v568_v9  ;;  %v574_v22 = vld [vmem:[#allocation5 + $0x30] sm:$0xff] }
  0x82   :  { %v575_v15 = vld [vmem:[#allocation5 + $0x38] sm:$0xff]  ;;  %v577_v23 = vld [vmem:[#allocation5 + $0x48] sm:$0xff]  ;;  %v584_v30 = vld [vmem:[#allocation5 + $0x80] sm:$0xff] }
  0x83   :  { %1708 = vmatpush1.bf16.msra.mxu0 %v1707_v44  ;;  %v1745_v44 = vpack.c.bf16 %v425_v42, %v422_v41  ;;  %v579_v26 = vld [vmem:[#allocation5 + $0x58] sm:$0xff]  ;;  %v581_v27 = vld [vmem:[#allocation5 + $0x68] sm:$0xff]  ;;  %v630_v31 = vld [vmem:[#allocation5 + $0x1f0] sm:$0xff]  ;;  %v1787_v33 = vpack.c.bf16 %v577_v23, %v574_v22 }
  0x84   :  { %1710 = vmatprep.subr.bf16.mxu0 %v1709_v45  ;;  %1772 = vmatpush3.bf16.msra.mxu1 %v1771_v50  ;;  %v426_v45 = vld [vmem:[#allocation2 + $0x2f8] sm:$0xff]  ;;  %v375_v50 = vld [vmem:[#allocation2 + $0x160] sm:$0xff]  ;;  %v582_v39 = vld [vmem:[#allocation5 + $0x70] sm:$0xff] }
  0x85   :  { %1774 = vmatprep.subr.bf16.mxu1 %v1773_v36  ;;  %v1777_v48 = vpack.c.bf16 %v426_v45, %v423_v43  ;;  %v580_v35 = vld [vmem:[#allocation5 + $0x60] sm:$0xff]  ;;  %v583_v36 = vld [vmem:[#allocation5 + $0x78] sm:$0xff]  ;;  %v590_v42 = vld [vmem:[#allocation5 + $0xb0] sm:$0xff] }
  0x86   :  { %v587_v41 = vld [vmem:[#allocation5 + $0x98] sm:$0xff]  ;;  %v636_v43 = vld [vmem:[#allocation5 + $0x220] sm:$0xff]  ;;  %v1791_v45 = vpack.c.bf16 %v583_v36, %v580_v35  ;;  %v586_v47 = vld [vmem:[#allocation5 + $0x90] sm:$0xff] }
  0x87   :  { %1712 = vmatpush1.bf16.msra.mxu0 %v1711_v51  ;;  %v378_v51 = vld [vmem:[#allocation2 + $0x178] sm:$0xff]  ;;  %v593_v53 = vld [vmem:[#allocation5 + $0xc8] sm:$0xff]  ;;  %v596_v54 = vld [vmem:[#allocation5 + $0xe0] sm:$0xff] }
  0x88   :  { %1714 = vmatprep.subr.bf16.mxu0 %v1713_v52  ;;  %1776 = vmatpush3.bf16.msra.mxu1 %v1775_v40  ;;  %v1779_v52 = vpack.c.bf16 %v378_v51, %v375_v50  ;;  %v585_v40 = vld [vmem:[#allocation5 + $0x88] sm:$0xff]  ;;  %v588_v51 = vld [vmem:[#allocation5 + $0xa0] sm:$0xff]  ;;  %v598_v11 = vld [vmem:[#allocation5 + $0xf0] sm:$0xff] }
  0x89   :  { %1778 = vmatprep.subr.bf16.mxu1 %v1777_v48  ;;  %v1855_v46 = vpack.c.bf16 %v585_v40, %v582_v39  ;;  %v589_v48 = vld [vmem:[#allocation5 + $0xa8] sm:$0xff]  ;;  %v592_v59 = vld [vmem:[#allocation5 + $0xc0] sm:$0xff]  ;;  %v610_v36 = vld [vmem:[#allocation5 + $0x150] sm:$0xff] }
  0x8a   :  { %v604_v23 = vld [vmem:[#allocation5 + $0x120] sm:$0xff]  ;;  %v613_v39 = vld [vmem:[#allocation5 + $0x168] sm:$0xff] }
  0x8b   :  { %1716 = vmatpush1.bf16.msra.mxu0 %v1715_v57  ;;  %v621_v57 = vld [vmem:[#allocation5 + $0x1a8] sm:$0xff]  ;;  %v612_v40 = vld [vmem:[#allocation5 + $0x160] sm:$0xff] }
  0x8c   :  { %1718 = vmatprep.subr.bf16.mxu0 %v1717_v58  ;;  %1780 = vmatpush3.bf16.msra.mxu1 %v1779_v52  ;;  %v1845_v58 = vpack.c.bf16 %v621_v57, %v618_v55  ;;  %v591_v52 = vld [vmem:[#allocation5 + $0xb8] sm:$0xff]  ;;  %v642_v55 = vld [vmem:[#allocation5 + $0x250] sm:$0xff]  ;;  %v1795_v57 = vpack.c.bf16 %v589_v48, %v586_v47  ;;  %v616_v47 = vld [vmem:[#allocation5 + $0x180] sm:$0xff] }
  0x8d   :  { %1782 = vmatprep.subr.bf16.mxu1 %v1781_v56  ;;  %v645_v56 = vld [vmem:[#allocation5 + $0x268] sm:$0xff]  ;;  %v619_v48 = vld [vmem:[#allocation5 + $0x198] sm:$0xff] }
  0x8f   :  { %1720 = vmatpush1.bf16.msra.mxu0 %v1719_v63  ;;  %v323_v63 = vsub.s32 1, %v2454_v60 }
  0x90   :  { %1722 = vmatprep.subr.bf16.mxu0 %v1721_v1 }
  0x91   :  { %v324_v5 = vrot.slane %v315_v62, %v323_v63  ;;  %v595_v62 = vld [vmem:[#allocation5 + $0xd8] sm:$0xff] }
  0x92   :  { %v1799_v9 = vpack.c.bf16 %v595_v62, %v592_v59  ;;  %v628_v59 = vld [vmem:[#allocation5 + $0x1e0] sm:$0xff]  ;;  %v631_v62 = vld [vmem:[#allocation5 + $0x1f8] sm:$0xff] }
  0x93   :  { %1724 = vmatpush1.bf16.msra.mxu0 %v1723_v6 }
  0x94   :  { %1726 = vmatprep.subr.bf16.mxu0 %v1725_v7 }
  0x97   :  { %1728 = vmatpush1.bf16.msra.mxu0 %v1727_v12  ;;  %v570_v12 = vld [vmem:[#allocation5 + $0x10] sm:$0xff] }
  0x98   :  { %1730 = vmatprep.subr.bf16.mxu0 %v1729_v13  ;;  %v573_v13 = vld [vmem:[#allocation5 + $0x28] sm:$0xff] }
  0x99   :  { %v1847_v21 = vpack.c.bf16 %v573_v13, %v570_v12  ;;  %v601_v12 = vld [vmem:[#allocation5 + $0x108] sm:$0xff] }
  0x9b   :  { %1732 = vmatpush1.bf16.msra.mxu0 %v1731_v18  ;;  %v627_v18 = vld [vmem:[#allocation5 + $0x1d8] sm:$0xff] }
  0x9c   :  { %1734 = vmatprep.subr.bf16.mxu0 %v1733_v19  ;;  %v1849_v29 = vpack.c.bf16 %v627_v18, %v624_v17  ;;  %v605_v17 = vld [vmem:[#allocation5 + $0x128] sm:$0xff]  ;;  %v608_v18 = vld [vmem:[#allocation5 + $0x140] sm:$0xff] }
  0x9f   :  { %1736 = vmatpush1.bf16.msra.mxu0 %v1735_v24 }
  0xa0   :  { %1738 = vmatprep.subr.bf16.mxu0 %v1737_v25  ;;  %v576_v25 = vld [vmem:[#allocation5 + $0x40] sm:$0xff] }
  0xa1   :  { %v1851_v34 = vpack.c.bf16 %v579_v26, %v576_v25  ;;  %v607_v25 = vld [vmem:[#allocation5 + $0x138] sm:$0xff]  ;;  %v1805_v26 = vpack.c.bf16 %v608_v18, %v605_v17  ;;  %v646_v17 = vld [vmem:[#allocation5 + $0x270] sm:$0xff]  ;;  %v649_v18 = vld [vmem:[#allocation5 + $0x288] sm:$0xff] }
  0xa3   :  { %1740 = vmatpush1.bf16.msra.mxu0 %v1739_v28  ;;  %v1785_v28 = vpack.c.bf16 %v578_v16, %v575_v15  ;;  %v600_v15 = vld [vmem:[#allocation5 + $0x100] sm:$0xff]  ;;  %v603_v16 = vld [vmem:[#allocation5 + $0x118] sm:$0xff] }
  0xa4   :  { %1742 = vmatprep.subr.bf16.mxu0 %v1741_v32  ;;  %v633_v32 = vld [vmem:[#allocation5 + $0x208] sm:$0xff]  ;;  %v1867_v22 = vpack.c.bf16 %v603_v16, %v600_v15 }
  0xa5   :  { %v1853_v38 = vpack.c.bf16 %v633_v32, %v630_v31  ;;  %v614_v31 = vld [vmem:[#allocation5 + $0x170] sm:$0xff]  ;;  %v660_v32 = vld [vmem:[#allocation5 + $0x2e0] sm:$0xff] }
  0xa7   :  { %1744 = vmatpush1.bf16.msra.mxu0 %v1743_v37  ;;  %v1789_v37 = vpack.c.bf16 %v584_v30, %v581_v27  ;;  %v611_v30 = vld [vmem:[#allocation5 + $0x158] sm:$0xff] }
  0xa8   :  { %1746 = vmatprep.subr.bf16.mxu0 %v1745_v44  ;;  %v639_v44 = vld [vmem:[#allocation5 + $0x238] sm:$0xff] }
  0xa9   :  { %v1857_v50 = vpack.c.bf16 %v639_v44, %v636_v43  ;;  %v620_v43 = vld [vmem:[#allocation5 + $0x1a0] sm:$0xff]  ;;  %v1811_v44 = vpack.c.bf16 %v613_v39, %v610_v36  ;;  %v2119_v36 = vmov 0.0|0.0  }
  0xab   :  { %1748 = vmatpush1.bf16.msra.mxu0 %v1747_v49  ;;  %v1793_v49 = vpack.c.bf16 %v590_v42, %v587_v41  ;;  %v615_v41 = vld [vmem:[#allocation5 + $0x178] sm:$0xff]  ;;  %v617_v42 = vld [vmem:[#allocation5 + $0x188] sm:$0xff] }
  0xac   :  { %1846 = vmatprep.subr.bf16.mxu0 %v1845_v58  ;;  %v1859_v58 = vpack.c.bf16 %v591_v52, %v588_v51  ;;  %v1815_v51 = vpack.c.bf16 %v619_v48, %v616_v47  ;;  %v839_v48 = vld [vmem:[%s2701_s6 + $0x30] sm:$0xff] }
 0x141   :  { %v237_v1 = vpop.f32.mrb[0].mxu0 }
 0x142   :  { %v308_v3 = vpop.f32.mrb[0].mxu1  ;;  %v239_v4 = vpop.f32.mrb[1].mxu0 }
 0x143   :  { %v313_v6 = vmax.f32 %v237_v1, %v308_v3  ;;  %v310_v7 = vpop.f32.mrb[1].mxu1  ;;  %v1797_v1 = vpack.c.bf16 %v596_v54, %v593_v53  ;;  %v594_v3 = vld [vmem:[#allocation5 + $0xd0] sm:$0xff]  ;;  %v625_v54 = vld [vmem:[#allocation5 + $0x1c8] sm:$0xff] }
 0x144   :  { %v314_v8 = vmax.f32 %v239_v4, %v310_v7  ;;  %v597_v4 = vld [vmem:[#allocation5 + $0xe8] sm:$0xff]  ;;  %v648_v7 = vld [vmem:[#allocation5 + $0x280] sm:$0xff]  ;;  %v622_v53 = vld [vmem:[#allocation5 + $0x1b0] sm:$0xff] }
 0x145   :  { %v327_v10 = vadd.f32 %v320_v2, %v313_v6  ;;  %v1861_v2 = vpack.c.bf16 %v645_v56, %v642_v55  ;;  %v602_v6 = vld [vmem:[#allocation5 + $0x110] sm:$0xff]  ;;  %v629_v55 = vld [vmem:[#allocation5 + $0x1e8] sm:$0xff]  ;;  %v632_v56 = vld [vmem:[#allocation5 + $0x200] sm:$0xff] }
 0x146   :  { %v328_v14 = vadd.f32 %v324_v5, %v314_v8  ;;  %v599_v5 = vld [vmem:[#allocation5 + $0xf8] sm:$0xff] }
 0x147   :  { %v2465_v24 = vmax.f32 %v327_v10, 0.0  ;;  %v651_v8 = vld [vmem:[#allocation5 + $0x298] sm:$0xff]  ;;  %v1863_v10 = vpack.c.bf16 %v597_v4, %v594_v3  ;;  %v1801_v13 = vpack.c.bf16 %v602_v6, %v599_v5  ;;  %v1823_v3 = vpack.c.bf16 %v631_v62, %v628_v59  ;;  %v634_v5 = vld [vmem:[#allocation5 + $0x210] sm:$0xff]  ;;  %v637_v6 = vld [vmem:[#allocation5 + $0x228] sm:$0xff] }
 0x148   :  { %v330_v19 = vmax.f32 %v328_v14, 0.0  ;;  %v1865_v14 = vpack.c.bf16 %v651_v8, %v648_v7  ;;  %v641_v7 = vld [vmem:[#allocation5 + $0x248] sm:$0xff]  ;;  %v644_v8 = vld [vmem:[#allocation5 + $0x260] sm:$0xff]  ;;  %v843_v62 = vld [vmem:[%s2701_s6 + $0x50] sm:$0xff] }
 0x14a   :  { %491 = vmatprep.mubr.f32.mxu0 %v330_v19  ;;  %562 = vmatprep.mubr.f32.mxu1 %v330_v19 }
 0x14b   :  { %492 = vmatmul.mubr.f32.vlgmr.msra.gmra.mrb[2].mxu0 %v2465_v24  ;;  %563 = vmatmul.mubr.f32.vlgmr.msra.gmra.mrb[2].mxu1 %v2465_v24 }
 0x14c   :  { %1784 = vmatpush1.bf16.msra.mxu1 %v1783_v20  ;;  %1848 = vmatpush3.bf16.msra.mxu0 %v1847_v21  ;;  %v657_v20 = vld [vmem:[#allocation5 + $0x2c8] sm:$0xff]  ;;  %v1803_v21 = vpack.c.bf16 %v601_v12, %v598_v11  ;;  %v640_v11 = vld [vmem:[#allocation5 + $0x240] sm:$0xff]  ;;  %v643_v12 = vld [vmem:[#allocation5 + $0x258] sm:$0xff] }
 0x14d   :  { %728 = vmatprep.mubr.f32.mxu1 %v330_v19  ;;  %799 = vmatprep.mubr.f32.mxu0 %v330_v19  ;;  %v654_v19 = vld [vmem:[#allocation5 + $0x2b0] sm:$0xff]  ;;  %v1831_v15 = vpack.c.bf16 %v643_v12, %v640_v11 }
 0x14e   :  { %1786 = vmatprep.subr.bf16.mxu1 %v1785_v28  ;;  %1850 = vmatprep.subr.bf16.mxu0 %v1849_v29  ;;  %v1869_v27 = vpack.c.bf16 %v657_v20, %v654_v19  ;;  %v606_v28 = vld [vmem:[#allocation5 + $0x130] sm:$0xff]  ;;  %v609_v29 = vld [vmem:[#allocation5 + $0x148] sm:$0xff]  ;;  %v656_v20 = vld [vmem:[#allocation5 + $0x2c0] sm:$0xff] }
 0x14f   :  { %v1871_v35 = vpack.c.bf16 %v609_v29, %v606_v28  ;;  %v653_v19 = vld [vmem:[#allocation5 + $0x2a8] sm:$0xff]  ;;  %v847_v12 = vld [vmem:[%s2701_s6 + $0x70] sm:$0xff] }
 0x150   :  { %1788 = vmatpush1.bf16.msra.mxu1 %v1787_v33  ;;  %1852 = vmatpush3.bf16.msra.mxu0 %v1851_v34  ;;  %v663_v33 = vld [vmem:[#allocation5 + $0x2f8] sm:$0xff]  ;;  %v1807_v34 = vpack.c.bf16 %v607_v25, %v604_v23  ;;  %v652_v23 = vld [vmem:[#allocation5 + $0x2a0] sm:$0xff] }
 0x151   :  { %1790 = vmatprep.subr.bf16.mxu1 %v1789_v37  ;;  %1854 = vmatprep.subr.bf16.mxu0 %v1853_v38  ;;  %v1809_v37 = vpack.c.bf16 %v614_v31, %v611_v30  ;;  %v1873_v38 = vpack.c.bf16 %v663_v33, %v660_v32  ;;  %v655_v25 = vld [vmem:[#allocation5 + $0x2b8] sm:$0xff]  ;;  %v658_v30 = vld [vmem:[#allocation5 + $0x2d0] sm:$0xff]  ;;  %v661_v31 = vld [vmem:[#allocation5 + $0x2e8] sm:$0xff] }
 0x152   :  { %v1839_v28 = vpack.c.bf16 %v655_v25, %v652_v23  ;;  %v1843_v32 = vpack.c.bf16 %v661_v31, %v658_v30  ;;  %v833_v33 = vld [vmem:[%s2701_s6] sm:$0xff]  ;;  %v820_v31 = vsub.s32 2, %v2454_v60  ;;  %v1036_v60 = vld [vmem:[#allocation8] sm:$0xff] }
 0x154   :  { %1792 = vmatpush1.bf16.msra.mxu1 %v1791_v45  ;;  %1856 = vmatpush3.bf16.msra.mxu0 %v1855_v46  ;;  %v1875_v45 = vpack.c.bf16 %v615_v41, %v612_v40  ;;  %v1813_v46 = vpack.c.bf16 %v620_v43, %v617_v42  ;;  %v928_v40 = vld [vmem:[%s2703_s8 + $0x8] sm:$0xff]  ;;  %v837_v41 = vld [vmem:[%s2701_s6 + $0x20] sm:$0xff] }
 0x155   :  { %1794 = vmatprep.subr.bf16.mxu1 %v1793_v49  ;;  %1858 = vmatprep.subr.bf16.mxu0 %v1857_v50  ;;  %v623_v49 = vld [vmem:[#allocation5 + $0x1b8] sm:$0xff]  ;;  %v626_v50 = vld [vmem:[#allocation5 + $0x1d0] sm:$0xff]  ;;  %v838_v42 = vld [vmem:[%s2701_s6 + $0x28] sm:$0xff] }
 0x156   :  { %v1817_v52 = vpack.c.bf16 %v626_v50, %v623_v49  ;;  %v840_v49 = vld [vmem:[%s2701_s6 + $0x38] sm:$0xff]  ;;  %v931_v50 = vld [vmem:[%s2703_s8 + $0x20] sm:$0xff] }
 0x158   :  { %1796 = vmatpush1.bf16.msra.mxu1 %v1795_v57  ;;  %1860 = vmatpush3.bf16.msra.mxu0 %v1859_v58  ;;  %v1819_v57 = vpack.c.bf16 %v625_v54, %v622_v53  ;;  %v1821_v58 = vpack.c.bf16 %v632_v56, %v629_v55  ;;  %v841_v54 = vld [vmem:[%s2701_s6 + $0x40] sm:$0xff]  ;;  %v842_v55 = vld [vmem:[%s2701_s6 + $0x48] sm:$0xff]  ;;  %v933_v56 = vld [vmem:[%s2703_s8 + $0x30] sm:$0xff] }
 0x159   :  { %1798 = vmatprep.subr.bf16.mxu1 %v1797_v1  ;;  %1862 = vmatprep.subr.bf16.mxu0 %v1861_v2  ;;  %v635_v1 = vld [vmem:[#allocation5 + $0x218] sm:$0xff]  ;;  %v638_v2 = vld [vmem:[#allocation5 + $0x230] sm:$0xff] }
 0x15a   :  { %v1825_v4 = vpack.c.bf16 %v638_v2, %v635_v1  ;;  %v844_v1 = vld [vmem:[%s2701_s6 + $0x58] sm:$0xff]  ;;  %v935_v2 = vld [vmem:[%s2703_s8 + $0x40] sm:$0xff] }
 0x15c   :  { %1800 = vmatpush1.bf16.msra.mxu1 %v1799_v9  ;;  %1864 = vmatpush3.bf16.msra.mxu0 %v1863_v10  ;;  %v1827_v9 = vpack.c.bf16 %v637_v6, %v634_v5  ;;  %v1829_v10 = vpack.c.bf16 %v644_v8, %v641_v7  ;;  %v845_v6 = vld [vmem:[%s2701_s6 + $0x60] sm:$0xff]  ;;  %v846_v7 = vld [vmem:[%s2701_s6 + $0x68] sm:$0xff] }
 0x15d   :  { %1802 = vmatprep.subr.bf16.mxu1 %v1801_v13  ;;  %1866 = vmatprep.subr.bf16.mxu0 %v1865_v14  ;;  %v647_v13 = vld [vmem:[#allocation5 + $0x278] sm:$0xff]  ;;  %v650_v14 = vld [vmem:[#allocation5 + $0x290] sm:$0xff]  ;;  %v1896_v8 = vpack.c.bf16 %v846_v7, %v845_v6  ;;  %v1026_v6 = vld [vmem:[#allocation7 + $0x28] sm:$0xff] }
 0x15e   :  { %v1833_v16 = vpack.c.bf16 %v650_v14, %v647_v13  ;;  %v848_v13 = vld [vmem:[%s2701_s6 + $0x78] sm:$0xff] }
 0x15f   :  { %v1899_v14 = vpack.c.bf16 %v848_v13, %v847_v12  ;;  %v1030_v12 = vld [vmem:[#allocation7 + $0x48] sm:$0xff] }
 0x160   :  { %1804 = vmatpush1.bf16.msra.mxu1 %v1803_v21  ;;  %1868 = vmatpush3.bf16.msra.mxu0 %v1867_v22  ;;  %v1835_v21 = vpack.c.bf16 %v649_v18, %v646_v17  ;;  %v1837_v22 = vpack.c.bf16 %v656_v20, %v653_v19  ;;  %v941_v18 = vld [vmem:[%s2703_s8 + $0x70] sm:$0xff]  ;;  %v942_v19 = vld [vmem:[%s2703_s8 + $0x78] sm:$0xff] }
 0x161   :  { %1806 = vmatprep.subr.bf16.mxu1 %v1805_v26  ;;  %1870 = vmatprep.subr.bf16.mxu0 %v1869_v27  ;;  %v659_v26 = vld [vmem:[#allocation5 + $0x2d8] sm:$0xff]  ;;  %v662_v27 = vld [vmem:[#allocation5 + $0x2f0] sm:$0xff]  ;;  %v1923_v20 = vpack.c.bf16 %v942_v19, %v941_v18  ;;  %v1034_v18 = vld [vmem:[#allocation7 + $0x68] sm:$0xff] }
 0x162   :  { %v1841_v29 = vpack.c.bf16 %v662_v27, %v659_v26  ;;  %v1321_v19 = vld [vmem:[%s2702_s7] ss:$0 sm:$0xff] }
 0x164   :  { %1808 = vmatpush1.bf16.msra.mxu1 %v1807_v34  ;;  %1872 = vmatpush3.bf16.msra.mxu0 %v1871_v35  ;;  %v834_v34 = vld [vmem:[%s2701_s6 + $0x8] sm:$0xff] }
 0x165   :  { %1810 = vmatprep.subr.bf16.mxu1 %v1809_v37  ;;  %1874 = vmatprep.subr.bf16.mxu0 %v1873_v38  ;;  %v1878_v35 = vpack.c.bf16 %v834_v34, %v833_v33  ;;  %v835_v37 = vld [vmem:[%s2701_s6 + $0x10] sm:$0xff]  ;;  %v927_v38 = vld [vmem:[%s2703_s8] sm:$0xff] }
 0x166   :  { %v1902_v43 = vpack.c.bf16 %v928_v40, %v927_v38 }
 0x168   :  { %1812 = vmatpush1.bf16.msra.mxu1 %v1811_v44  ;;  %1876 = vmatpush3.bf16.msra.mxu0 %v1875_v45  ;;  %v929_v44 = vld [vmem:[%s2703_s8 + $0x10] sm:$0xff]  ;;  %v930_v45 = vld [vmem:[%s2703_s8 + $0x18] sm:$0xff] }
 0x169   :  { %1814 = vmatprep.subr.bf16.mxu1 %v1813_v46  ;;  %1877 = vmatprep.subr.bf16.mxu0 %v2119_v36  ;;  %v1884_v46 = vpack.c.bf16 %v838_v42, %v837_v41  ;;  %v1905_v47 = vpack.c.bf16 %v930_v45, %v929_v44 }
 0x16b   :  { %800 = vmatmul.mubr.f32.vlgmr.msra.gmra.mrb[4].mxu0 %v2465_v24 }
 0x16c   :  { %1816 = vmatpush1.bf16.msra.mxu1 %v1815_v51  ;;  %1879 = vmatpush3.bf16.msra.mxu0 %v1878_v35  ;;  %v932_v51 = vld [vmem:[%s2703_s8 + $0x28] sm:$0xff] }
 0x16d   :  { %1818 = vmatprep.subr.bf16.mxu1 %v1817_v52  ;;  %1880 = vmatprep.subr.bf16.mxu0 %v2119_v36  ;;  %v1887_v52 = vpack.c.bf16 %v840_v49, %v839_v48  ;;  %v1908_v53 = vpack.c.bf16 %v932_v51, %v931_v50  ;;  %v1038_v48 = vld [vmem:[#allocation8 + $0x10] sm:$0xff]  ;;  %v1039_v49 = vld [vmem:[#allocation8 + $0x18] sm:$0xff]  ;;  %v1040_v51 = vld [vmem:[#allocation8 + $0x20] sm:$0xff] }
 0x16e   :  { %1502 = vmatprep.mubr.msk.f32.mxu0 %vm2120_vm0, %v2118_v0  ;;  %v1929_v50 = vpack.c.bf16 %v1039_v49, %v1038_v48  ;;  %v1325_v48 = vld [vmem:[%s2707_s12] ss:$0 sm:$0xff]  ;;  %s2121_s12 = smov [#allocation10]  }
 0x170   :  { %1820 = vmatpush1.bf16.msra.mxu1 %v1819_v57  ;;  %v934_v57 = vld [vmem:[%s2703_s8 + $0x38] sm:$0xff] }
 0x171   :  { %1822 = vmatprep.subr.bf16.mxu1 %v1821_v58  ;;  %v1890_v58 = vpack.c.bf16 %v842_v55, %v841_v54  ;;  %v1911_v59 = vpack.c.bf16 %v934_v57, %v933_v56  ;;  %v1322_v54 = vld [vmem:[%s2704_s9] ss:$0 sm:$0xff]  ;;  %v1022_v56 = vld [vmem:[#allocation7 + $0x8] sm:$0xff] }
 0x172   :  { %v1021_v55 = vld [vmem:[#allocation7] sm:$0xff] }
 0x174   :  { %1824 = vmatpush1.bf16.msra.mxu1 %v1823_v3  ;;  %v936_v3 = vld [vmem:[%s2703_s8 + $0x48] sm:$0xff] }
 0x175   :  { %1826 = vmatprep.subr.bf16.mxu1 %v1825_v4  ;;  %v1893_v4 = vpack.c.bf16 %v844_v1, %v843_v62  ;;  %v1914_v5 = vpack.c.bf16 %v936_v3, %v935_v2  ;;  %v1932_v62 = vpack.c.bf16 %v1022_v56, %v1021_v55  ;;  %v1023_v2 = vld [vmem:[#allocation7 + $0x10] sm:$0xff]  ;;  %v1024_v3 = vld [vmem:[#allocation7 + $0x18] sm:$0xff] }
 0x178   :  { %1828 = vmatpush1.bf16.msra.mxu1 %v1827_v9  ;;  %v937_v9 = vld [vmem:[%s2703_s8 + $0x50] sm:$0xff] }
 0x179   :  { %1830 = vmatprep.subr.bf16.mxu1 %v1829_v10  ;;  %v938_v10 = vld [vmem:[%s2703_s8 + $0x58] sm:$0xff] }
 0x17a   :  { %v1917_v11 = vpack.c.bf16 %v938_v10, %v937_v9  ;;  %v1028_v9 = vld [vmem:[#allocation7 + $0x38] sm:$0xff] }
 0x17c   :  { %1832 = vmatpush1.bf16.msra.mxu1 %v1831_v15  ;;  %v939_v15 = vld [vmem:[%s2703_s8 + $0x60] sm:$0xff] }
 0x17d   :  { %1834 = vmatprep.subr.bf16.mxu1 %v1833_v16  ;;  %v940_v16 = vld [vmem:[%s2703_s8 + $0x68] sm:$0xff] }
 0x17e   :  { %v1920_v17 = vpack.c.bf16 %v940_v16, %v939_v15  ;;  %v1032_v15 = vld [vmem:[#allocation7 + $0x58] sm:$0xff] }
 0x180   :  { %1836 = vmatpush1.bf16.msra.mxu1 %v1835_v21 }
 0x181   :  { %1838 = vmatprep.subr.bf16.mxu1 %v1837_v22 }
 0x184   :  { %1840 = vmatpush1.bf16.msra.mxu1 %v1839_v28 }
 0x185   :  { %1842 = vmatprep.subr.bf16.mxu1 %v1841_v29 }
 0x188   :  { %1844 = vmatpush1.bf16.msra.mxu1 %v1843_v32  ;;  %v808_v32 = vld [vmem:[%s2700_s5] sm:$0x7] }
 0x189   :  { %1901 = vmatprep.subr.bf16.mxu1 %v2119_v36  ;;  %v821_v33 = vrot.slane %v808_v32, %v820_v31  ;;  %v813_v34 = vrot.slane %v808_v32, %v319_v61  ;;  %v1037_v61 = vld [vmem:[#allocation8 + $0x8] sm:$0xff]  ;;  %v1203_v31 = vld [vmem:[%s2708_s13 + $0x28] sm:$0xff] }
 0x18b   :  { %729 = vmatmul.mubr.f32.vlgmr.msra.gmra.mrb[4].mxu1 %v2465_v24  ;;  %v836_v24 = vld [vmem:[%s2701_s6 + $0x18] sm:$0xff] }
 0x18c   :  { %v1881_v39 = vpack.c.bf16 %v836_v24, %v835_v37  ;;  %1903 = vmatpush3.bf16.msra.mxu1 %v1902_v43  ;;  %1537 = vmatprep.mubr.msk.f32.mxu1 %vm2120_vm0, %v2118_v0  ;;  %v817_v37 = vrot.slane %v808_v32, %v323_v63  ;;  %v1926_v63 = vpack.c.bf16 %v1037_v61, %v1036_v60 }
 0x18d   :  { %1904 = vmatprep.subr.bf16.mxu1 %v2119_v36 }
 0x18e   :  { %1882 = vmatpush3.bf16.msra.mxu0 %v1881_v39 }
 0x18f   :  { %1883 = vmatprep.subr.bf16.mxu0 %v2119_v36 }
 0x190   :  { %1906 = vmatpush3.bf16.msra.mxu1 %v1905_v47 }
 0x191   :  { %1907 = vmatprep.subr.bf16.mxu1 %v2119_v36 }
 0x192   :  { %1885 = vmatpush3.bf16.msra.mxu0 %v1884_v46 }
 0x193   :  { %1886 = vmatprep.subr.bf16.mxu0 %v2119_v36 }
 0x194   :  { %1909 = vmatpush3.bf16.msra.mxu1 %v1908_v53 }
 0x195   :  { %1910 = vmatprep.subr.bf16.mxu1 %v2119_v36 }
 0x196   :  { %1888 = vmatpush3.bf16.msra.mxu0 %v1887_v52 }
 0x197   :  { %1889 = vmatprep.subr.bf16.mxu0 %v2119_v36 }
 0x198   :  { %1912 = vmatpush3.bf16.msra.mxu1 %v1911_v59 }
 0x199   :  { %1913 = vmatprep.subr.bf16.mxu1 %v2119_v36 }
 0x19a   :  { %1891 = vmatpush3.bf16.msra.mxu0 %v1890_v58 }
 0x19b   :  { %1892 = vmatprep.subr.bf16.mxu0 %v2119_v36 }
 0x19c   :  { %1915 = vmatpush3.bf16.msra.mxu1 %v1914_v5  ;;  %v1025_v5 = vld [vmem:[#allocation7 + $0x20] sm:$0xff] }
 0x19d   :  { %1916 = vmatprep.subr.bf16.mxu1 %v2119_v36  ;;  %v1938_v7 = vpack.c.bf16 %v1026_v6, %v1025_v5 }
 0x19e   :  { %1894 = vmatpush3.bf16.msra.mxu0 %v1893_v4  ;;  %v1935_v4 = vpack.c.bf16 %v1024_v3, %v1023_v2 }
 0x19f   :  { %1895 = vmatprep.subr.bf16.mxu0 %v2119_v36 }
 0x1a0   :  { %1918 = vmatpush3.bf16.msra.mxu1 %v1917_v11  ;;  %v1029_v11 = vld [vmem:[#allocation7 + $0x40] sm:$0xff] }
 0x1a1   :  { %1919 = vmatprep.subr.bf16.mxu1 %v2119_v36  ;;  %v1944_v13 = vpack.c.bf16 %v1030_v12, %v1029_v11 }
 0x1a2   :  { %1897 = vmatpush3.bf16.msra.mxu0 %v1896_v8  ;;  %v1027_v8 = vld [vmem:[#allocation7 + $0x30] sm:$0xff] }
 0x1a3   :  { %1898 = vmatprep.subr.bf16.mxu0 %v2119_v36  ;;  %v1941_v10 = vpack.c.bf16 %v1028_v9, %v1027_v8 }
 0x1a4   :  { %1921 = vmatpush3.bf16.msra.mxu1 %v1920_v17  ;;  %v1033_v17 = vld [vmem:[#allocation7 + $0x60] sm:$0xff] }
 0x1a5   :  { %1922 = vmatprep.subr.bf16.mxu1 %v2119_v36 }
 0x1a6   :  { %1900 = vmatpush3.bf16.msra.mxu0 %v1899_v14  ;;  %v1031_v14 = vld [vmem:[#allocation7 + $0x50] sm:$0xff] }
 0x1a7   :  { %1952 = vmatprep.subr.bf16.mxu0 %v2119_v36  ;;  %v1947_v16 = vpack.c.bf16 %v1032_v15, %v1031_v14 }
 0x1a8   :  { %1924 = vmatpush3.bf16.msra.mxu1 %v1923_v20  ;;  %v1950_v20 = vpack.c.bf16 %v1034_v18, %v1033_v17 }
 0x1a9   :  { %1925 = vmatprep.subr.bf16.mxu1 %v2119_v36 }
 0x21e   :  { %v493_v21 = vpop.f32.mrb[2].mxu0  ;;  %v1359_v22 = vpop.f32.mrb[2].mxu1 }
 0x21f   :  { %v495_v23 = vpop.f32.mrb[3].mxu0  ;;  %v1360_v25 = vpop.f32.mrb[3].mxu1 }
 0x220   :  { %v1361_v26 = vadd.f32 %v1360_v25, %v1359_v22  ;;  %v1035_v22 = vld [vmem:[#allocation7 + $0x70] sm:$0xff]  ;;  %v1198_v25 = vld [vmem:[%s2708_s13] sm:$0xff] }
 0x23e   :  { %v1394_v27 = vpop.f32.mrb[4].mxu0 }
 0x23f   :  { %v1395_v28 = vpop.f32.mrb[5].mxu0 }
 0x240   :  { %v1396_v29 = vadd.f32 %v1395_v28, %v1394_v27  ;;  %v1200_v27 = vld [vmem:[%s2708_s13 + $0x10] sm:$0xff] }
 0x242   :  { %v807_v30 = vmax.f32 %v1361_v26, %v1396_v29  ;;  %v1199_v26 = vld [vmem:[%s2708_s13 + $0x8] sm:$0xff] }
 0x243   :  { %v1953_v28 = vpack.c.bf16 %v1199_v26, %v1198_v25 }
 0x244   :  { %v827_v39 = vadd.f32 %v821_v33, %v807_v30  ;;  %v1202_v30 = vld [vmem:[%s2708_s13 + $0x20] sm:$0xff]  ;;  %v1204_v33 = vld [vmem:[%s2708_s13 + $0x30] sm:$0xff] }
 0x245   :  { %v1959_v32 = vpack.c.bf16 %v1203_v31, %v1202_v30 }
 0x246   :  { %v830_v44 = vmax.f32 %v827_v39, 0.0  ;;  %v1208_v39 = vld [vmem:[%s2708_s13 + $0x50] sm:$0xff] }
 0x25e   :  { %v730_v35 = vpop.f32.mrb[4].mxu1 }
 0x25f   :  { %v805_v24 = vmax.f32 %v493_v21, %v730_v35  ;;  %v732_v38 = vpop.f32.mrb[5].mxu1 }
 0x260   :  { %v806_v40 = vmax.f32 %v495_v23, %v732_v38 }
 0x261   :  { %v825_v41 = vadd.f32 %v813_v34, %v805_v24  ;;  %v1205_v34 = vld [vmem:[%s2708_s13 + $0x38] sm:$0xff]  ;;  %v1207_v24 = vld [vmem:[%s2708_s13 + $0x48] sm:$0xff] }
 0x262   :  { %v826_v42 = vadd.f32 %v817_v37, %v806_v40  ;;  %v1962_v35 = vpack.c.bf16 %v1205_v34, %v1204_v33  ;;  %v1206_v37 = vld [vmem:[%s2708_s13 + $0x40] sm:$0xff]  ;;  %v1209_v40 = vld [vmem:[%s2708_s13 + $0x58] sm:$0xff] }
 0x263   :  { %v828_v43 = vmax.f32 %v825_v41, 0.0  ;;  %v1965_v38 = vpack.c.bf16 %v1207_v24, %v1206_v37  ;;  %v1968_v41 = vpack.c.bf16 %v1209_v40, %v1208_v39 }
 0x264   :  { %v829_v45 = vmax.f32 %v826_v42, 0.0  ;;  %v1210_v42 = vld [vmem:[%s2708_s13 + $0x60] sm:$0xff] }
 0x265   :  { %1503 = vmatmul.mubr.f32.vlgmr.msra.gmra.mrb[6].mxu0 %v828_v43 }
 0x266   :  { %v831_v46 = vmax.f32 %v829_v45, %v830_v44  ;;  %1618 = vmatprep.mubr.msk.f32.mxu0 %vm2120_vm0, %v2118_v0  ;;  %1954 = vmatpush3.bf16.msra.mxu0 %v1953_v28  ;;  %v1212_v45 = vld [vmem:[%s2708_s13 + $0x70] sm:$0xff] }
 0x267   :  { %1955 = vmatprep.subr.bf16.mxu0 %v2119_v36 }
 0x268   :  { %v832_v47 = vmax.f32 %v828_v43, %v831_v46  ;;  %v1211_v43 = vld [vmem:[%s2708_s13 + $0x68] sm:$0xff]  ;;  %v1213_v46 = vld [vmem:[%s2708_s13 + $0x78] sm:$0xff] }
 0x269   :  { %v1971_v44 = vpack.c.bf16 %v1211_v43, %v1210_v42 }
 0x26a   :  { %1538 = vmatmul.mubr.f32.vlgmr.msra.gmra.mrb[6].mxu1 %v832_v47  ;;  %v1974_v47 = vpack.c.bf16 %v1213_v46, %v1212_v45 }
 0x26b   :  { %1550 = vmatprep.mubr.msk.f32.mxu1 %vm2120_vm0, %v2118_v0  ;;  %1927 = vmatpush3.bf16.msra.mxu1 %v1926_v63 }
 0x26c   :  { %1928 = vmatprep.subr.bf16.mxu1 %v2119_v36 }
 0x26f   :  { %1930 = vmatpush3.bf16.msra.mxu1 %v1929_v50 }
 0x270   :  { %1548 = vmatprep.subr.mxu1 %v2118_v0 }
 0x273   :  { %1549 = vmatpush3.msra.mxu1 %v1040_v51 }
 0x274   :  { %1931 = vmatprep.subr.bf16.mxu1 %v2119_v36 }
 0x338   :  { %v922_v52 = vpop.f32.mrb[6].mxu0 }
 0x339   :  { %v1504_v53 = vpop.f32.mrb[7].mxu0  ;;  %v923_v21 = vadd.f32 %v1321_v19, %v922_v52  ;;  %v1326_v52 = vld [vmem:[%s2709_s14] ss:$0 sm:$0xff] }
 0x33b   :  { %v926_v23 = vmax.f32 %v923_v21, 0.0 }
 0x33d   :  { %v1016_v57 = vpop.f32.mrb[6].mxu1 }
 0x33e   :  { %v1017_v58 = vadd.f32 %v1322_v54, %v1016_v57  ;;  %v1539_v59 = vpop.f32.mrb[7].mxu1 }
 0x340   :  { %v1020_v1 = vmax.f32 %v1017_v58, 0.0 }
 0x342   :  { %1551 = vmatmul.mubr.msk.f32.vlgmr.msra.gmra.mrb[8].mxu1 %vm1041_vm1, %v1020_v1 }
 0x343   :  { %1933 = vmatpush3.bf16.msra.mxu1 %v1932_v62  ;;  %1583 = vmatprep.mubr.msk.f32.mxu1 %vm2120_vm0, %v2118_v0 }
 0x344   :  { %1934 = vmatprep.subr.bf16.mxu1 %v2119_v36 }
 0x347   :  { %1936 = vmatpush3.bf16.msra.mxu1 %v1935_v4 }
 0x348   :  { %1937 = vmatprep.subr.bf16.mxu1 %v2119_v36 }
 0x34b   :  { %1939 = vmatpush3.bf16.msra.mxu1 %v1938_v7 }
 0x34c   :  { %1940 = vmatprep.subr.bf16.mxu1 %v2119_v36 }
 0x34f   :  { %1942 = vmatpush3.bf16.msra.mxu1 %v1941_v10 }
 0x350   :  { %1943 = vmatprep.subr.bf16.mxu1 %v2119_v36 }
 0x353   :  { %1945 = vmatpush3.bf16.msra.mxu1 %v1944_v13 }
 0x354   :  { %1946 = vmatprep.subr.bf16.mxu1 %v2119_v36 }
 0x357   :  { %1948 = vmatpush3.bf16.msra.mxu1 %v1947_v16 }
 0x358   :  { %1949 = vmatprep.subr.bf16.mxu1 %v2119_v36 }
 0x35b   :  { %1951 = vmatpush3.bf16.msra.mxu1 %v1950_v20 }
 0x35c   :  { %1581 = vmatprep.subr.mxu1 %v2118_v0  ;;  %v1201_v0 = vld [vmem:[%s2708_s13 + $0x18] sm:$0xff]  ;;  %s1310_s13 = sshll.u32 %s2121_s12, 4  ;;  %s1311_s13 = int_to_ptr.vmem [resolvable:$true] %s1310_s13 }
 0x35d   :  { %v1956_v29 = vpack.c.bf16 %v1201_v0, %v1200_v27  ;;  %s2080_s14 = scalar_lea.vmem %s1311_s13, 32  ;;  %p2085_p5 = scmp.lt.s32.totalorder %s1311_s13, %s1311_s13 }
 0x35e   :  { %p2081_p4 = scmp.ne.s32.totalorder %s1311_s13, %s2080_s14  ;;  %p2086_p6 = scmp.lt.s32.totalorder %s2080_s14, %s2080_s14 }
 0x35f   :  { %1582 = vmatpush3.msra.mxu1 %v1035_v22  ;;  %1957 = vmatpush3.bf16.msra.mxu0 %v1956_v29 }
 0x360   :  { %1584 = vmatmul.mubr.msk.f32.vlgmr.msra.gmra.mrb[10].mxu1 %vm1115_vm2, %v926_v23  ;;  %1958 = vmatprep.subr.bf16.mxu0 %v2119_v36  ;;  %p2087_p7 = por %p2086_p6, %p2085_p5 }
 0x362   :  { %p2088_p8 = pnand %p2087_p7, %p2081_p4 }
 0x363   :  { %1960 = vmatpush3.bf16.msra.mxu0 %v1959_v32 }
 0x364   :  { %1961 = vmatprep.subr.bf16.mxu0 %v2119_v36 }
 0x367   :  { %1963 = vmatpush3.bf16.msra.mxu0 %v1962_v35 }
 0x368   :  { %1964 = vmatprep.subr.bf16.mxu0 %v2119_v36 }
 0x36b   :  { %1966 = vmatpush3.bf16.msra.mxu0 %v1965_v38 }
 0x36c   :  { %1967 = vmatprep.subr.bf16.mxu0 %v2119_v36 }
 0x36f   :  { %1969 = vmatpush3.bf16.msra.mxu0 %v1968_v41 }
 0x370   :  { %1970 = vmatprep.subr.bf16.mxu0 %v2119_v36 }
 0x373   :  { %1972 = vmatpush3.bf16.msra.mxu0 %v1971_v44 }
 0x374   :  { %1973 = vmatprep.subr.bf16.mxu0 %v2119_v36 }
 0x377   :  { %1975 = vmatpush3.bf16.msra.mxu0 %v1974_v47 }
 0x415   :  { %v1111_v60 = vpop.f32.mrb[8].mxu1 }
 0x416   :  { %v1552_v61 = vpop.f32.mrb[9].mxu1 }
 0x433   :  { %v1185_v63 = vpop.f32.mrb[10].mxu1 }
 0x434   :  { %v1186_v49 = vadd.f32 %v1185_v63, %v1111_v60  ;;  %v1585_v50 = vpop.f32.mrb[11].mxu1 }
 0x436   :  { %v1196_v36 = vadd.f32 %v1325_v48, %v1186_v49 }
 0x438   :  { %v1197_v51 = vmax.f32 %v1196_v36, 0.0 }
 0x43a   :  { %1619 = vmatmul.mubr.f32.vlgmr.msra.gmra.mrb[8].mxu0 %v1197_v51 }
 0x50d   :  { %v1287_v53 = vpop.f32.mrb[8].mxu0 }
 0x50e   :  { %v1288_v54 = vadd.f32 %v1326_v52, %v1287_v53  ;;  %v1620_v55 = vpop.f32.mrb[9].mxu0 }
 0x510   :  { %v1292_v56 = vsel %vm1291_vm3, %v1288_v54, -inf }
 0x511   :  { %1293 = vmax.xlane.f32.xlu0 %v1292_v56 }
 0x59e   :  { %v1294_v57 = vpop.xlane.xlu0 %1293 }
 0x59f   :  { %v1295_v58 = vsub.f32 %v1288_v54, %v1294_v57 }
 0x5a1   :  { %v1296_v59 = vmul.f32 1.442695, %v1295_v58 }
 0x5a3   :  { %1988 = vpow2.f32 %v1296_v59 }
 0x5ad   :  { %v1989_v62 = vpop.eup %1988 }
 0x5ae   :  { %v1298_v1 = vsel %vm1291_vm3, %v1989_v62, 0.0 }
 0x5af   :  { %1299 = vadd.xlane.f32.xlu0 %v1298_v1 }
 0x63c   :  { %v1300_v2 = vpop.xlane.xlu0 %1299 }
 0x63d   :  { %1990 = vrcp.f32 %v1300_v2 }
 0x647   :  { %v1991_v3 = vpop.eup %1990 }
 0x648   :  { %v1302_v4 = vmul.f32 %v1991_v3, %v1989_v62 }
 0x64a   :  { %1303 = vst.msk [vmem:[#allocation10] sm:$0x3] %vm1291_vm3, %v1302_v4 }
 0x64b   :  { %2091 = shalt.err (!%p2088_p8)
}
 0x64c   :  { %s2092_s21 = scalar_lea.hbm %s2710_s15, 32 }
 0x64d   :  { %p2093_p9 = scmp.ne.s32.totalorder %s2710_s15, %s2092_s21  ;;  %p2096_p10 = scmp.lt.u32.totalorder %s2092_s21, %s2710_s15 }
 0x64f   :  { %p2098_p11 = pnand %p2096_p10, %p2093_p9 }
 0x651   :  { %2101 = shalt.err (!%p2098_p11)
}
 0x652   :  { %1313 = dma.vmem_to_hbm [thread:$0]  %s1311_s13, 32, %s2710_s15, [#allocation4]  }
 0x653   :  { %2108 = dma.done.wait [#allocation4], 32  }
 0x654   :  { %2109 = vsyncadd [#allocation4], 4294967264 }
 0x655   :  { %1317 = vsyncpa [#allocation3], 1 }
 0x656   :  { %1318 = vsyncpa [#allocation6], 1 }
 0x657   :  { %1319 = vsyncpa [#allocation9], 1 }
 0x658   :  { %1320 = vsyncpa [#allocation4], 1 }

</bundles_post_ra>
